<compile_context>
chip_gen: v7x
topology: tpu7x:2x2x1
jax: 0.10.0
libtpu: 0.0.40
codegen_flags: <defaults>
</compile_context>

<pallas_src>
import jax
import jax.numpy as jnp
from jax.experimental import pallas as pl
from jax.experimental.pallas import tpu as pltpu


def _up_block_kernel(a_ref, h_ref, w_ref, b_ref, o_ref, cols_ref, acc_ref):
    """One (batch, row-tile) grid step.

    a_ref   : (1, th, W+2, Cin)       main rows of the zero-padded (NOT upsampled) input
    h_ref   : (1, 2,  W+2, Cin)       2-row halo directly below the main rows
    w_ref   : (2, 2, 2, 3*Cin, Cout)  BN-folded, phase-collapsed, kx-im2col weights [a, b, dy]
    b_ref   : (1, Cout)               BN-folded bias (f32)
    o_ref   : (1, 2, 2, th, W, Cout)  output tile, phases (a, b) kept as separate dims
    cols_ref: (th+2, W, 3*Cin)        kx-im2col scratch
    acc_ref : (th*W, Cout) f32        accumulator scratch
    """
    th = a_ref.shape[1]
    w_out = o_ref.shape[4]
    cin = a_ref.shape[3]
    cout = o_ref.shape[5]

    # kx-im2col: cols[r, j, k*Cin:(k+1)*Cin] = padded_input[r, j+k, :], k in {0,1,2}.
    cols_ref[0:th, :, :] = jnp.concatenate(
        [a_ref[0, :, k:k + w_out, :] for k in range(3)], axis=-1)
    cols_ref[th:th + 2, :, :] = jnp.concatenate(
        [h_ref[0, :, k:k + w_out, :] for k in range(3)], axis=-1)

    for a in (0, 1):                                   # output row phase
        lhs0 = cols_ref[a:a + th, :, :].reshape(th * w_out, 3 * cin)
        lhs1 = cols_ref[a + 1:a + 1 + th, :, :].reshape(th * w_out, 3 * cin)
        for b in (0, 1):                               # output column phase
            acc_ref[...] = jnp.dot(lhs0, w_ref[a, b, 0],
                                   preferred_element_type=jnp.float32)
            acc_ref[...] += jnp.dot(lhs1, w_ref[a, b, 1],
                                    preferred_element_type=jnp.float32)
            y = jnp.maximum(acc_ref[...] + b_ref[...], 0.0)      # bias (BN) + ReLU, f32
            o_ref[0, a, b] = y.reshape(th, w_out, cout).astype(o_ref.dtype)


def _phase_weights(w_oihw):
    """(Cout, Cin, 3, 3) BN-folded OIHW weights -> (2, 2, 2, 3*Cin, Cout) indexed [a, b, dy].

    The 3*Cin axis is the kx-im2col K axis: block k multiplies input column j+k; for column
    phase b the two active blocks are k = b and k = b+1 (the remaining block is zero).
    """
    cout, cin = w_oihw.shape[0], w_oihw.shape[1]
    wk = jnp.transpose(w_oihw, (2, 3, 1, 0))           # (ky, kx, Cin, Cout)

    def collapse(w, phase, axis):
        # nearest-2x upsample collapse: phase 0 -> [tap0, tap1+tap2]; phase 1 -> [tap0+tap1, tap2]
        w0, w1, w2 = (jnp.take(w, i, axis=axis) for i in range(3))
        if phase == 0:
            return jnp.stack([w0, w1 + w2], axis=axis)
        return jnp.stack([w0 + w1, w2], axis=axis)

    per_a = []
    for a in (0, 1):
        wa = collapse(wk, a, axis=0)                   # (2[dy], 3[kx], Cin, Cout)
        per_b = []
        for b in (0, 1):
            wab = collapse(wa, b, axis=1)              # (2[dy], 2[dx], Cin, Cout)
            per_dy = []
            for dy in (0, 1):
                slab = jnp.zeros((3, cin, cout), wab.dtype)
                slab = slab.at[b].set(wab[dy, 0]).at[b + 1].set(wab[dy, 1])
                per_dy.append(slab.reshape(3 * cin, cout))
            per_b.append(jnp.stack(per_dy, axis=0))    # (2[dy], 3*Cin, Cout)
        per_a.append(jnp.stack(per_b, axis=0))         # (2[b], 2[dy], 3*Cin, Cout)
    return jnp.stack(per_a, axis=0)                    # (2[a], 2[b], 2[dy], 3*Cin, Cout)


def _pick_row_tile(h, w, cin, cout, itemsize, budget_bytes=4 * 1024 * 1024):
    """Largest even divisor of H whose double-buffered in+out tile fits a small VMEM budget
    (keeps us comfortably inside v7x's 32 MiB scoped VMEM)."""
    best = 2
    for th in range(2, h + 1, 2):
        if h % th:
            continue
        in_b = 2 * th * (w + 2) * cin * itemsize            # double-buffered input block
        out_b = 2 * 4 * th * w * cout * 4                   # double-buffered output block
        scratch = (th + 2) * w * 3 * cin * itemsize + th * w * cout * 4
        if in_b + out_b + scratch <= budget_bytes:
            best = th
    return best


def up_block_forward(x, conv_w, conv_b, gamma, beta, run_mean, run_var,
                     eps=1e-5, row_tile=None, compute_dtype=None):
    """x: (N, Cin, H, W) NCHW. Returns (N, Cout, 2H, 2W) NCHW."""
    N, Cin, H, W = x.shape
    Cout = conv_w.shape[0]

    if row_tile is None:
        row_tile = _pick_row_tile(H, W, Cin, Cout, jnp.dtype(x.dtype).itemsize)
    th = int(row_tile)
    if H % 2 or th % 2 or H % th:
        raise ValueError(f"row_tile={th} must be even and divide an even H={H}")
    n_tiles = H // th

    # ---- glue on the SMALL (not upsampled) tensor only: NCHW->NHWC + 1-px zero pad ----
    x_nhwc = jnp.transpose(x, (0, 2, 3, 1))                        # (N, H, W, Cin)
    xpad = jnp.pad(x_nhwc, ((0, 0), (1, 1), (1, 1), (0, 0)))       # (N, H+2, W+2, Cin)

    # ---- fold eval-mode BN, then build phase-collapsed kx-im2col weights ----
    scale = gamma / jnp.sqrt(run_var + eps)
    w_eff = conv_w * scale[:, None, None, None]                    # (Cout, Cin, 3, 3)
    b_eff = (conv_b - run_mean) * scale + beta                     # (Cout,)
    w3 = _phase_weights(w_eff)                                     # (2, 2, 2, 3*Cin, Cout)
    b2 = b_eff.reshape(1, Cout).astype(jnp.float32)

    if compute_dtype is not None:                                  # e.g. bf16 on v6e/v7x
        xpad = xpad.astype(compute_dtype)
        w3 = w3.astype(compute_dtype)

    out_dtype = x.dtype
    flops = 2 * N * (2 * H) * (2 * W) * 9 * Cin * Cout             # nominal conv FLOPs
    bytes_accessed = (xpad.size * xpad.dtype.itemsize
                      + w3.size * w3.dtype.itemsize
                      + N * 4 * H * W * Cout * jnp.dtype(out_dtype).itemsize)

    out6 = pl.pallas_call(
        _up_block_kernel,
        out_shape=jax.ShapeDtypeStruct((N, 2, 2, H, W, Cout), out_dtype),
        grid=(N, n_tiles),
        in_specs=[
            # main rows of the padded small input for this tile: [t*th, t*th + th)
            pl.BlockSpec((1, th, W + 2, Cin), lambda n, t: (n, t, 0, 0)),
            # 2-row halo just below the main rows: [(t+1)*th, (t+1)*th + 2)
            pl.BlockSpec((1, 2, W + 2, Cin),
                         lambda n, t: (n, (t + 1) * (th // 2), 0, 0)),
            pl.BlockSpec((2, 2, 2, 3 * Cin, Cout), lambda n, t: (0, 0, 0, 0, 0)),
            pl.BlockSpec((1, Cout), lambda n, t: (0, 0)),
        ],
        out_specs=pl.BlockSpec((1, 2, 2, th, W, Cout),
                               lambda n, t: (n, 0, 0, t, 0, 0)),
        scratch_shapes=[
            pltpu.VMEM((th + 2, W, 3 * Cin), xpad.dtype),          # kx-im2col scratch
            pltpu.VMEM((th * W, Cout), jnp.float32),               # f32 accumulator
        ],
        compiler_params=pltpu.CompilerParams(
            dimension_semantics=("parallel", "parallel"),
            vmem_limit_bytes=32 * 1024 * 1024,
        ),
        cost_estimate=pl.CostEstimate(flops=flops, transcendentals=0,
                                      bytes_accessed=bytes_accessed),
    )(xpad, xpad, w3, b2)

    # Interleave phases + NHWC->NCHW in a single pass: [n,a,b,i,j,c] -> [n,c,2i+a,2j+b].
    return jnp.transpose(out6, (0, 5, 3, 1, 4, 2)).reshape(N, Cout, 2 * H, 2 * W)


def up_block_reference(x, conv_w, conv_b, gamma, beta, run_mean, run_var, eps=1e-5):
    """Pure-JAX reference (upsample + lax.conv + BN + ReLU), NCHW."""
    x_up = jnp.repeat(jnp.repeat(x, 2, axis=2), 2, axis=3)
    y = jax.lax.conv_general_dilated(
        x_up, conv_w, window_strides=(1, 1), padding=((1, 1), (1, 1)),
        dimension_numbers=("NCHW", "OIHW", "NCHW"))
    y = y + conv_b[None, :, None, None]
    y = (y - run_mean[None, :, None, None]) * (
        gamma[None, :, None, None] / jnp.sqrt(run_var[None, :, None, None] + eps)
    ) + beta[None, :, None, None]
    return jnp.maximum(y, 0.0)


if __name__ == "__main__":
    key = jax.random.PRNGKey(0)
    k_x, k_w, k_b, k_g, k_be, k_m, k_v = jax.random.split(key, 7)

    N, CH_IN, CH_OUT, H, W = 2, 8, 4, 16, 16

    x = jax.random.normal(k_x, (N, CH_IN, H, W), dtype=jnp.float32)
    conv_w = jax.random.normal(k_w, (CH_OUT, CH_IN, 3, 3), dtype=jnp.float32) * 0.1
    conv_b = jax.random.normal(k_b, (CH_OUT,), dtype=jnp.float32) * 0.1
    gamma = jax.random.uniform(k_g, (CH_OUT,), minval=0.5, maxval=1.5, dtype=jnp.float32)
    beta = jax.random.normal(k_be, (CH_OUT,), dtype=jnp.float32) * 0.1
    run_mean = jax.random.normal(k_m, (CH_OUT,), dtype=jnp.float32) * 0.1
    run_var = jax.random.uniform(k_v, (CH_OUT,), minval=0.5, maxval=1.5, dtype=jnp.float32)

    out = up_block_forward(x, conv_w, conv_b, gamma, beta, run_mean, run_var, row_tile=8)
    out = jax.block_until_ready(out)

    ref = jax.block_until_ready(
        up_block_reference(x, conv_w, conv_b, gamma, beta, run_mean, run_var))

    assert out.shape == (N, CH_OUT, 2 * H, 2 * W), out.shape
    max_err = float(jnp.max(jnp.abs(out - ref)))
    assert jnp.allclose(out, ref, atol=1e-4, rtol=1e-4), max_err

    print("KERNEL_OK")
</pallas_src>

<mosaic_0001>
module attributes {stable_mosaic.version = 11 : i64} {
  func.func @_up_block_kernel(%arg0: i32, %arg1: i32, %arg2: memref<1x8x18x8xf32, #tpu.memory_space<vmem>>, %arg3: memref<1x2x18x8xf32, #tpu.memory_space<vmem>>, %arg4: memref<2x2x2x24x4xf32, #tpu.memory_space<vmem>>, %arg5: memref<1x4xf32, #tpu.memory_space<vmem>>, %arg6: memref<1x2x2x8x16x4xf32, #tpu.memory_space<vmem>>, %arg7: memref<10x16x24xf32, #tpu.memory_space<vmem>>, %arg8: memref<128x4xf32, #tpu.memory_space<vmem>>) attributes {dimension_semantics = [#tpu.dimension_semantics<parallel>, #tpu.dimension_semantics<parallel>], iteration_bounds = array<i64: 2, 2>, scalar_prefetch = 0 : i64, scratch_operands = 2 : i64, tpu.core_type = #tpu.core_type<tc>, window_params = [{transform_indices = @transform_0, window_bounds = array<i64: 1, 8, 18, 8>}, {transform_indices = @transform_1, window_bounds = array<i64: 1, 2, 18, 8>}, {pipeline_mode = #tpu.pipeline_mode<synchronous>, transform_indices = @transform_2, window_bounds = array<i64: 2, 2, 2, 24, 4>}, {pipeline_mode = #tpu.pipeline_mode<synchronous>, transform_indices = @transform_3, window_bounds = array<i64: 1, 4>}, {transform_indices = @transform_4, window_bounds = array<i64: 1, 2, 2, 8, 16, 4>}]} {
    %c0 = arith.constant 0 : index
    %c0_0 = arith.constant 0 : index
    %c0_1 = arith.constant 0 : index
    %c0_2 = arith.constant 0 : index
    %0 = vector.load %arg2[%c0, %c0_0, %c0_1, %c0_2] : memref<1x8x18x8xf32, #tpu.memory_space<vmem>>, vector<1x8x16x8xf32>
    %1 = vector.shape_cast %0 : vector<1x8x16x8xf32> to vector<8x16x8xf32>
    %c0_3 = arith.constant 0 : index
    %c0_4 = arith.constant 0 : index
    %c1 = arith.constant 1 : index
    %c0_5 = arith.constant 0 : index
    %2 = vector.load %arg2[%c0_3, %c0_4, %c1, %c0_5] : memref<1x8x18x8xf32, #tpu.memory_space<vmem>>, vector<1x8x16x8xf32>
    %3 = vector.shape_cast %2 : vector<1x8x16x8xf32> to vector<8x16x8xf32>
    %c0_6 = arith.constant 0 : index
    %c0_7 = arith.constant 0 : index
    %c2 = arith.constant 2 : index
    %c0_8 = arith.constant 0 : index
    %4 = vector.load %arg2[%c0_6, %c0_7, %c2, %c0_8] : memref<1x8x18x8xf32, #tpu.memory_space<vmem>>, vector<1x8x16x8xf32>
    %5 = vector.shape_cast %4 : vector<1x8x16x8xf32> to vector<8x16x8xf32>
    %6 = tpu.concatenate %1, %3, %5 in 2 : vector<8x16x8xf32>, vector<8x16x8xf32>, vector<8x16x8xf32> -> vector<8x16x24xf32>
    %c0_9 = arith.constant 0 : index
    %c0_10 = arith.constant 0 : index
    %c0_11 = arith.constant 0 : index
    %7 = vector.load %arg7[%c0_9, %c0_10, %c0_11] : memref<10x16x24xf32, #tpu.memory_space<vmem>>, vector<8x16x24xf32>
    tpu.vector_store %arg7[%c0_9, %c0_10, %c0_11], %6 {strides = array<i32>} : memref<10x16x24xf32, #tpu.memory_space<vmem>>, vector<8x16x24xf32>,
    %c0_12 = arith.constant 0 : index
    %c0_13 = arith.constant 0 : index
    %c0_14 = arith.constant 0 : index
    %c0_15 = arith.constant 0 : index
    %8 = vector.load %arg3[%c0_12, %c0_13, %c0_14, %c0_15] : memref<1x2x18x8xf32, #tpu.memory_space<vmem>>, vector<1x2x16x8xf32>
    %9 = vector.shape_cast %8 : vector<1x2x16x8xf32> to vector<2x16x8xf32>
    %c0_16 = arith.constant 0 : index
    %c0_17 = arith.constant 0 : index
    %c1_18 = arith.constant 1 : index
    %c0_19 = arith.constant 0 : index
    %10 = vector.load %arg3[%c0_16, %c0_17, %c1_18, %c0_19] : memref<1x2x18x8xf32, #tpu.memory_space<vmem>>, vector<1x2x16x8xf32>
    %11 = vector.shape_cast %10 : vector<1x2x16x8xf32> to vector<2x16x8xf32>
    %c0_20 = arith.constant 0 : index
    %c0_21 = arith.constant 0 : index
    %c2_22 = arith.constant 2 : index
    %c0_23 = arith.constant 0 : index
    %12 = vector.load %arg3[%c0_20, %c0_21, %c2_22, %c0_23] : memref<1x2x18x8xf32, #tpu.memory_space<vmem>>, vector<1x2x16x8xf32>
    %13 = vector.shape_cast %12 : vector<1x2x16x8xf32> to vector<2x16x8xf32>
    %14 = tpu.concatenate %9, %11, %13 in 2 : vector<2x16x8xf32>, vector<2x16x8xf32>, vector<2x16x8xf32> -> vector<2x16x24xf32>
    %c8 = arith.constant 8 : index
    %c0_24 = arith.constant 0 : index
    %c0_25 = arith.constant 0 : index
    %15 = vector.load %arg7[%c8, %c0_24, %c0_25] : memref<10x16x24xf32, #tpu.memory_space<vmem>>, vector<2x16x24xf32>
    tpu.vector_store %arg7[%c8, %c0_24, %c0_25], %14 {strides = array<i32>} : memref<10x16x24xf32, #tpu.memory_space<vmem>>, vector<2x16x24xf32>,
    %c0_26 = arith.constant 0 : index
    %c0_27 = arith.constant 0 : index
    %c0_28 = arith.constant 0 : index
    %16 = vector.load %arg7[%c0_26, %c0_27, %c0_28] : memref<10x16x24xf32, #tpu.memory_space<vmem>>, vector<8x16x24xf32>
    %17 = vector.shape_cast %16 : vector<8x16x24xf32> to vector<128x24xf32>
    %c1_29 = arith.constant 1 : index
    %c0_30 = arith.constant 0 : index
    %c0_31 = arith.constant 0 : index
    %18 = vector.load %arg7[%c1_29, %c0_30, %c0_31] : memref<10x16x24xf32, #tpu.memory_space<vmem>>, vector<8x16x24xf32>
    %19 = vector.shape_cast %18 : vector<8x16x24xf32> to vector<128x24xf32>
    %c0_32 = arith.constant 0 : index
    %c0_33 = arith.constant 0 : index
    %c0_34 = arith.constant 0 : index
    %c0_35 = arith.constant 0 : index
    %c0_36 = arith.constant 0 : index
    %20 = vector.load %arg4[%c0_32, %c0_33, %c0_34, %c0_35, %c0_36] : memref<2x2x2x24x4xf32, #tpu.memory_space<vmem>>, vector<1x1x1x24x4xf32>
    %21 = vector.shape_cast %20 : vector<1x1x1x24x4xf32> to vector<24x4xf32>
    %cst = arith.constant dense<0.000000e+00> : vector<128x4xf32>
    %22 = tpu.matmul %17, %21, %cst {dimension_numbers = #tpu.dot_dimension_numbers<[1], [0], [0], [1], [0, 0, 1, 1], [], []>} : vector<128x24xf32>, vector<24x4xf32>, vector<128x4xf32> -> vector<128x4xf32>
    %c0_37 = arith.constant 0 : index
    %c0_38 = arith.constant 0 : index
    %23 = vector.load %arg8[%c0_37, %c0_38] : memref<128x4xf32, #tpu.memory_space<vmem>>, vector<128x4xf32>
    tpu.vector_store %arg8[%c0_37, %c0_38], %22 {strides = array<i32>} : memref<128x4xf32, #tpu.memory_space<vmem>>, vector<128x4xf32>,
    %c0_39 = arith.constant 0 : index
    %c0_40 = arith.constant 0 : index
    %24 = vector.load %arg8[%c0_39, %c0_40] : memref<128x4xf32, #tpu.memory_space<vmem>>, vector<128x4xf32>
    %c0_41 = arith.constant 0 : index
    %c0_42 = arith.constant 0 : index
    %c1_43 = arith.constant 1 : index
    %c0_44 = arith.constant 0 : index
    %c0_45 = arith.constant 0 : index
    %25 = vector.load %arg4[%c0_41, %c0_42, %c1_43, %c0_44, %c0_45] : memref<2x2x2x24x4xf32, #tpu.memory_space<vmem>>, vector<1x1x1x24x4xf32>
    %26 = vector.shape_cast %25 : vector<1x1x1x24x4xf32> to vector<24x4xf32>
    %cst_46 = arith.constant dense<0.000000e+00> : vector<128x4xf32>
    %27 = tpu.matmul %19, %26, %cst_46 {dimension_numbers = #tpu.dot_dimension_numbers<[1], [0], [0], [1], [0, 0, 1, 1], [], []>} : vector<128x24xf32>, vector<24x4xf32>, vector<128x4xf32> -> vector<128x4xf32>
    %28 = arith.addf %24, %27 : vector<128x4xf32>
    %c0_47 = arith.constant 0 : index
    %c0_48 = arith.constant 0 : index
    %29 = vector.load %arg8[%c0_47, %c0_48] : memref<128x4xf32, #tpu.memory_space<vmem>>, vector<128x4xf32>
    tpu.vector_store %arg8[%c0_47, %c0_48], %28 {strides = array<i32>} : memref<128x4xf32, #tpu.memory_space<vmem>>, vector<128x4xf32>,
    %c0_49 = arith.constant 0 : index
    %c0_50 = arith.constant 0 : index
    %30 = vector.load %arg8[%c0_49, %c0_50] : memref<128x4xf32, #tpu.memory_space<vmem>>, vector<128x4xf32>
    %c0_51 = arith.constant 0 : index
    %c0_52 = arith.constant 0 : index
    %31 = vector.load %arg5[%c0_51, %c0_52] : memref<1x4xf32, #tpu.memory_space<vmem>>, vector<1x4xf32>
    %32 = vector.broadcast %31 : vector<1x4xf32> to vector<128x4xf32>
    %33 = arith.addf %30, %32 : vector<128x4xf32>
    %cst_53 = arith.constant 0.000000e+00 : f32
    %34 = vector.broadcast %cst_53 : f32 to vector<128x4xf32>
    %35 = arith.maximumf %33, %34 : vector<128x4xf32>
    %36 = vector.shape_cast %35 : vector<128x4xf32> to vector<8x16x4xf32>
    %c0_54 = arith.constant 0 : index
    %c0_55 = arith.constant 0 : index
    %c0_56 = arith.constant 0 : index
    %c0_57 = arith.constant 0 : index
    %c0_58 = arith.constant 0 : index
    %c0_59 = arith.constant 0 : index
    %37 = vector.load %arg6[%c0_54, %c0_55, %c0_56, %c0_57, %c0_58, %c0_59] : memref<1x2x2x8x16x4xf32, #tpu.memory_space<vmem>>, vector<1x1x1x8x16x4xf32>
    %38 = vector.shape_cast %37 : vector<1x1x1x8x16x4xf32> to vector<8x16x4xf32>
    %39 = vector.shape_cast %36 : vector<8x16x4xf32> to vector<1x1x1x8x16x4xf32>
    tpu.vector_store %arg6[%c0_54, %c0_55, %c0_56, %c0_57, %c0_58, %c0_59], %39 {strides = array<i32>} : memref<1x2x2x8x16x4xf32, #tpu.memory_space<vmem>>, vector<1x1x1x8x16x4xf32>,
    %c0_60 = arith.constant 0 : index
    %c1_61 = arith.constant 1 : index
    %c0_62 = arith.constant 0 : index
    %c0_63 = arith.constant 0 : index
    %c0_64 = arith.constant 0 : index
    %40 = vector.load %arg4[%c0_60, %c1_61, %c0_62, %c0_63, %c0_64] : memref<2x2x2x24x4xf32, #tpu.memory_space<vmem>>, vector<1x1x1x24x4xf32>
    %41 = vector.shape_cast %40 : vector<1x1x1x24x4xf32> to vector<24x4xf32>
    %cst_65 = arith.constant dense<0.000000e+00> : vector<128x4xf32>
    %42 = tpu.matmul %17, %41, %cst_65 {dimension_numbers = #tpu.dot_dimension_numbers<[1], [0], [0], [1], [0, 0, 1, 1], [], []>} : vector<128x24xf32>, vector<24x4xf32>, vector<128x4xf32> -> vector<128x4xf32>
    %c0_66 = arith.constant 0 : index
    %c0_67 = arith.constant 0 : index
    %43 = vector.load %arg8[%c0_66, %c0_67] : memref<128x4xf32, #tpu.memory_space<vmem>>, vector<128x4xf32>
    tpu.vector_store %arg8[%c0_66, %c0_67], %42 {strides = array<i32>} : memref<128x4xf32, #tpu.memory_space<vmem>>, vector<128x4xf32>,
    %c0_68 = arith.constant 0 : index
    %c0_69 = arith.constant 0 : index
    %44 = vector.load %arg8[%c0_68, %c0_69] : memref<128x4xf32, #tpu.memory_space<vmem>>, vector<128x4xf32>
    %c0_70 = arith.constant 0 : index
    %c1_71 = arith.constant 1 : index
    %c1_72 = arith.constant 1 : index
    %c0_73 = arith.constant 0 : index
    %c0_74 = arith.constant 0 : index
    %45 = vector.load %arg4[%c0_70, %c1_71, %c1_72, %c0_73, %c0_74] : memref<2x2x2x24x4xf32, #tpu.memory_space<vmem>>, vector<1x1x1x24x4xf32>
    %46 = vector.shape_cast %45 : vector<1x1x1x24x4xf32> to vector<24x4xf32>
    %cst_75 = arith.constant dense<0.000000e+00> : vector<128x4xf32>
    %47 = tpu.matmul %19, %46, %cst_75 {dimension_numbers = #tpu.dot_dimension_numbers<[1], [0], [0], [1], [0, 0, 1, 1], [], []>} : vector<128x24xf32>, vector<24x4xf32>, vector<128x4xf32> -> vector<128x4xf32>
    %48 = arith.addf %44, %47 : vector<128x4xf32>
    %c0_76 = arith.constant 0 : index
    %c0_77 = arith.constant 0 : index
    %49 = vector.load %arg8[%c0_76, %c0_77] : memref<128x4xf32, #tpu.memory_space<vmem>>, vector<128x4xf32>
    tpu.vector_store %arg8[%c0_76, %c0_77], %48 {strides = array<i32>} : memref<128x4xf32, #tpu.memory_space<vmem>>, vector<128x4xf32>,
    %c0_78 = arith.constant 0 : index
    %c0_79 = arith.constant 0 : index
    %50 = vector.load %arg8[%c0_78, %c0_79] : memref<128x4xf32, #tpu.memory_space<vmem>>, vector<128x4xf32>
    %c0_80 = arith.constant 0 : index
    %c0_81 = arith.constant 0 : index
    %51 = vector.load %arg5[%c0_80, %c0_81] : memref<1x4xf32, #tpu.memory_space<vmem>>, vector<1x4xf32>
    %52 = vector.broadcast %51 : vector<1x4xf32> to vector<128x4xf32>
    %53 = arith.addf %50, %52 : vector<128x4xf32>
    %cst_82 = arith.constant 0.000000e+00 : f32
    %54 = vector.broadcast %cst_82 : f32 to vector<128x4xf32>
    %55 = arith.maximumf %53, %54 : vector<128x4xf32>
    %56 = vector.shape_cast %55 : vector<128x4xf32> to vector<8x16x4xf32>
    %c0_83 = arith.constant 0 : index
    %c0_84 = arith.constant 0 : index
    %c1_85 = arith.constant 1 : index
    %c0_86 = arith.constant 0 : index
    %c0_87 = arith.constant 0 : index
    %c0_88 = arith.constant 0 : index
    %57 = vector.load %arg6[%c0_83, %c0_84, %c1_85, %c0_86, %c0_87, %c0_88] : memref<1x2x2x8x16x4xf32, #tpu.memory_space<vmem>>, vector<1x1x1x8x16x4xf32>
    %58 = vector.shape_cast %57 : vector<1x1x1x8x16x4xf32> to vector<8x16x4xf32>
    %59 = vector.shape_cast %56 : vector<8x16x4xf32> to vector<1x1x1x8x16x4xf32>
    tpu.vector_store %arg6[%c0_83, %c0_84, %c1_85, %c0_86, %c0_87, %c0_88], %59 {strides = array<i32>} : memref<1x2x2x8x16x4xf32, #tpu.memory_space<vmem>>, vector<1x1x1x8x16x4xf32>,
    %c1_89 = arith.constant 1 : index
    %c0_90 = arith.constant 0 : index
    %c0_91 = arith.constant 0 : index
    %60 = vector.load %arg7[%c1_89, %c0_90, %c0_91] : memref<10x16x24xf32, #tpu.memory_space<vmem>>, vector<8x16x24xf32>
    %61 = vector.shape_cast %60 : vector<8x16x24xf32> to vector<128x24xf32>
    %c2_92 = arith.constant 2 : index
    %c0_93 = arith.constant 0 : index
    %c0_94 = arith.constant 0 : index
    %62 = vector.load %arg7[%c2_92, %c0_93, %c0_94] : memref<10x16x24xf32, #tpu.memory_space<vmem>>, vector<8x16x24xf32>
    %63 = vector.shape_cast %62 : vector<8x16x24xf32> to vector<128x24xf32>
    %c1_95 = arith.constant 1 : index
    %c0_96 = arith.constant 0 : index
    %c0_97 = arith.constant 0 : index
    %c0_98 = arith.constant 0 : index
    %c0_99 = arith.constant 0 : index
    %64 = vector.load %arg4[%c1_95, %c0_96, %c0_97, %c0_98, %c0_99] : memref<2x2x2x24x4xf32, #tpu.memory_space<vmem>>, vector<1x1x1x24x4xf32>
    %65 = vector.shape_cast %64 : vector<1x1x1x24x4xf32> to vector<24x4xf32>
    %cst_100 = arith.constant dense<0.000000e+00> : vector<128x4xf32>
    %66 = tpu.matmul %61, %65, %cst_100 {dimension_numbers = #tpu.dot_dimension_numbers<[1], [0], [0], [1], [0, 0, 1, 1], [], []>} : vector<128x24xf32>, vector<24x4xf32>, vector<128x4xf32> -> vector<128x4xf32>
    %c0_101 = arith.constant 0 : index
    %c0_102 = arith.constant 0 : index
    %67 = vector.load %arg8[%c0_101, %c0_102] : memref<128x4xf32, #tpu.memory_space<vmem>>, vector<128x4xf32>
    tpu.vector_store %arg8[%c0_101, %c0_102], %66 {strides = array<i32>} : memref<128x4xf32, #tpu.memory_space<vmem>>, vector<128x4xf32>,
    %c0_103 = arith.constant 0 : index
    %c0_104 = arith.constant 0 : index
    %68 = vector.load %arg8[%c0_103, %c0_104] : memref<128x4xf32, #tpu.memory_space<vmem>>, vector<128x4xf32>
    %c1_105 = arith.constant 1 : index
    %c0_106 = arith.constant 0 : index
    %c1_107 = arith.constant 1 : index
    %c0_108 = arith.constant 0 : index
    %c0_109 = arith.constant 0 : index
    %69 = vector.load %arg4[%c1_105, %c0_106, %c1_107, %c0_108, %c0_109] : memref<2x2x2x24x4xf32, #tpu.memory_space<vmem>>, vector<1x1x1x24x4xf32>
    %70 = vector.shape_cast %69 : vector<1x1x1x24x4xf32> to vector<24x4xf32>
    %cst_110 = arith.constant dense<0.000000e+00> : vector<128x4xf32>
    %71 = tpu.matmul %63, %70, %cst_110 {dimension_numbers = #tpu.dot_dimension_numbers<[1], [0], [0], [1], [0, 0, 1, 1], [], []>} : vector<128x24xf32>, vector<24x4xf32>, vector<128x4xf32> -> vector<128x4xf32>
    %72 = arith.addf %68, %71 : vector<128x4xf32>
    %c0_111 = arith.constant 0 : index
    %c0_112 = arith.constant 0 : index
    %73 = vector.load %arg8[%c0_111, %c0_112] : memref<128x4xf32, #tpu.memory_space<vmem>>, vector<128x4xf32>
    tpu.vector_store %arg8[%c0_111, %c0_112], %72 {strides = array<i32>} : memref<128x4xf32, #tpu.memory_space<vmem>>, vector<128x4xf32>,
    %c0_113 = arith.constant 0 : index
    %c0_114 = arith.constant 0 : index
    %74 = vector.load %arg8[%c0_113, %c0_114] : memref<128x4xf32, #tpu.memory_space<vmem>>, vector<128x4xf32>
    %c0_115 = arith.constant 0 : index
    %c0_116 = arith.constant 0 : index
    %75 = vector.load %arg5[%c0_115, %c0_116] : memref<1x4xf32, #tpu.memory_space<vmem>>, vector<1x4xf32>
    %76 = vector.broadcast %75 : vector<1x4xf32> to vector<128x4xf32>
    %77 = arith.addf %74, %76 : vector<128x4xf32>
    %cst_117 = arith.constant 0.000000e+00 : f32
    %78 = vector.broadcast %cst_117 : f32 to vector<128x4xf32>
    %79 = arith.maximumf %77, %78 : vector<128x4xf32>
    %80 = vector.shape_cast %79 : vector<128x4xf32> to vector<8x16x4xf32>
    %c0_118 = arith.constant 0 : index
    %c1_119 = arith.constant 1 : index
    %c0_120 = arith.constant 0 : index
    %c0_121 = arith.constant 0 : index
    %c0_122 = arith.constant 0 : index
    %c0_123 = arith.constant 0 : index
    %81 = vector.load %arg6[%c0_118, %c1_119, %c0_120, %c0_121, %c0_122, %c0_123] : memref<1x2x2x8x16x4xf32, #tpu.memory_space<vmem>>, vector<1x1x1x8x16x4xf32>
    %82 = vector.shape_cast %81 : vector<1x1x1x8x16x4xf32> to vector<8x16x4xf32>
    %83 = vector.shape_cast %80 : vector<8x16x4xf32> to vector<1x1x1x8x16x4xf32>
    tpu.vector_store %arg6[%c0_118, %c1_119, %c0_120, %c0_121, %c0_122, %c0_123], %83 {strides = array<i32>} : memref<1x2x2x8x16x4xf32, #tpu.memory_space<vmem>>, vector<1x1x1x8x16x4xf32>,
    %c1_124 = arith.constant 1 : index
    %c1_125 = arith.constant 1 : index
    %c0_126 = arith.constant 0 : index
    %c0_127 = arith.constant 0 : index
    %c0_128 = arith.constant 0 : index
    %84 = vector.load %arg4[%c1_124, %c1_125, %c0_126, %c0_127, %c0_128] : memref<2x2x2x24x4xf32, #tpu.memory_space<vmem>>, vector<1x1x1x24x4xf32>
    %85 = vector.shape_cast %84 : vector<1x1x1x24x4xf32> to vector<24x4xf32>
    %cst_129 = arith.constant dense<0.000000e+00> : vector<128x4xf32>
    %86 = tpu.matmul %61, %85, %cst_129 {dimension_numbers = #tpu.dot_dimension_numbers<[1], [0], [0], [1], [0, 0, 1, 1], [], []>} : vector<128x24xf32>, vector<24x4xf32>, vector<128x4xf32> -> vector<128x4xf32>
    %c0_130 = arith.constant 0 : index
    %c0_131 = arith.constant 0 : index
    %87 = vector.load %arg8[%c0_130, %c0_131] : memref<128x4xf32, #tpu.memory_space<vmem>>, vector<128x4xf32>
    tpu.vector_store %arg8[%c0_130, %c0_131], %86 {strides = array<i32>} : memref<128x4xf32, #tpu.memory_space<vmem>>, vector<128x4xf32>,
    %c0_132 = arith.constant 0 : index
    %c0_133 = arith.constant 0 : index
    %88 = vector.load %arg8[%c0_132, %c0_133] : memref<128x4xf32, #tpu.memory_space<vmem>>, vector<128x4xf32>
    %c1_134 = arith.constant 1 : index
    %c1_135 = arith.constant 1 : index
    %c1_136 = arith.constant 1 : index
    %c0_137 = arith.constant 0 : index
    %c0_138 = arith.constant 0 : index
    %89 = vector.load %arg4[%c1_134, %c1_135, %c1_136, %c0_137, %c0_138] : memref<2x2x2x24x4xf32, #tpu.memory_space<vmem>>, vector<1x1x1x24x4xf32>
    %90 = vector.shape_cast %89 : vector<1x1x1x24x4xf32> to vector<24x4xf32>
    %cst_139 = arith.constant dense<0.000000e+00> : vector<128x4xf32>
    %91 = tpu.matmul %63, %90, %cst_139 {dimension_numbers = #tpu.dot_dimension_numbers<[1], [0], [0], [1], [0, 0, 1, 1], [], []>} : vector<128x24xf32>, vector<24x4xf32>, vector<128x4xf32> -> vector<128x4xf32>
    %92 = arith.addf %88, %91 : vector<128x4xf32>
    %c0_140 = arith.constant 0 : index
    %c0_141 = arith.constant 0 : index
    %93 = vector.load %arg8[%c0_140, %c0_141] : memref<128x4xf32, #tpu.memory_space<vmem>>, vector<128x4xf32>
    tpu.vector_store %arg8[%c0_140, %c0_141], %92 {strides = array<i32>} : memref<128x4xf32, #tpu.memory_space<vmem>>, vector<128x4xf32>,
    %c0_142 = arith.constant 0 : index
    %c0_143 = arith.constant 0 : index
    %94 = vector.load %arg8[%c0_142, %c0_143] : memref<128x4xf32, #tpu.memory_space<vmem>>, vector<128x4xf32>
    %c0_144 = arith.constant 0 : index
    %c0_145 = arith.constant 0 : index
    %95 = vector.load %arg5[%c0_144, %c0_145] : memref<1x4xf32, #tpu.memory_space<vmem>>, vector<1x4xf32>
    %96 = vector.broadcast %95 : vector<1x4xf32> to vector<128x4xf32>
    %97 = arith.addf %94, %96 : vector<128x4xf32>
    %cst_146 = arith.constant 0.000000e+00 : f32
    %98 = vector.broadcast %cst_146 : f32 to vector<128x4xf32>
    %99 = arith.maximumf %97, %98 : vector<128x4xf32>
    %100 = vector.shape_cast %99 : vector<128x4xf32> to vector<8x16x4xf32>
    %c0_147 = arith.constant 0 : index
    %c1_148 = arith.constant 1 : index
    %c1_149 = arith.constant 1 : index
    %c0_150 = arith.constant 0 : index
    %c0_151 = arith.constant 0 : index
    %c0_152 = arith.constant 0 : index
    %101 = vector.load %arg6[%c0_147, %c1_148, %c1_149, %c0_150, %c0_151, %c0_152] : memref<1x2x2x8x16x4xf32, #tpu.memory_space<vmem>>, vector<1x1x1x8x16x4xf32>
    %102 = vector.shape_cast %101 : vector<1x1x1x8x16x4xf32> to vector<8x16x4xf32>
    %103 = vector.shape_cast %100 : vector<8x16x4xf32> to vector<1x1x1x8x16x4xf32>
    tpu.vector_store %arg6[%c0_147, %c1_148, %c1_149, %c0_150, %c0_151, %c0_152], %103 {strides = array<i32>} : memref<1x2x2x8x16x4xf32, #tpu.memory_space<vmem>>, vector<1x1x1x8x16x4xf32>,
    return
  }
  func.func @transform_0(%arg0: i32, %arg1: i32) -> (i32, i32, i32, i32) {
    %c0_i32 = arith.constant 0 : i32
    %c0_i32_0 = arith.constant 0 : i32
    %c0_i32_1 = arith.constant 0 : i32
    return %arg0, %arg1, %c0_i32, %c0_i32_0 : i32, i32, i32, i32
  }
  func.func @transform_1(%arg0: i32, %arg1: i32) -> (i32, i32, i32, i32) {
    %c1_i32 = arith.constant 1 : i32
    %0 = arith.addi %arg1, %c1_i32 : i32
    %c4_i32 = arith.constant 4 : i32
    %1 = arith.muli %0, %c4_i32 : i32
    %c0_i32 = arith.constant 0 : i32
    %c0_i32_0 = arith.constant 0 : i32
    %c0_i32_1 = arith.constant 0 : i32
    return %arg0, %1, %c0_i32, %c0_i32_0 : i32, i32, i32, i32
  }
  func.func @transform_2(%arg0: i32, %arg1: i32) -> (i32, i32, i32, i32, i32) {
    %c0_i32 = arith.constant 0 : i32
    %c0_i32_0 = arith.constant 0 : i32
    %c0_i32_1 = arith.constant 0 : i32
    %c0_i32_2 = arith.constant 0 : i32
    %c0_i32_3 = arith.constant 0 : i32
    %c0_i32_4 = arith.constant 0 : i32
    return %c0_i32, %c0_i32_0, %c0_i32_1, %c0_i32_2, %c0_i32_3 : i32, i32, i32, i32, i32
  }
  func.func @transform_3(%arg0: i32, %arg1: i32) -> (i32, i32) {
    %c0_i32 = arith.constant 0 : i32
    %c0_i32_0 = arith.constant 0 : i32
    %c0_i32_1 = arith.constant 0 : i32
    return %c0_i32, %c0_i32_0 : i32, i32
  }
  func.func @transform_4(%arg0: i32, %arg1: i32) -> (i32, i32, i32, i32, i32, i32) {
    %c0_i32 = arith.constant 0 : i32
    %c0_i32_0 = arith.constant 0 : i32
    %c0_i32_1 = arith.constant 0 : i32
    %c0_i32_2 = arith.constant 0 : i32
    %c0_i32_3 = arith.constant 0 : i32
    return %arg0, %c0_i32, %c0_i32_0, %arg1, %c0_i32_1, %c0_i32_2 : i32, i32, i32, i32, i32, i32
  }
}

</mosaic_0001>

<bundles_post_ra>
// kernel: tpu_custom_call.1
= control target key start
LH: loop header
LB: loop body
LE: loop exit
PB: predicated region body
PF: predicated region fallthrough
CT: control target
= control target key end

     0   :  { %s3773_s15 = smov 0   ;;  %s3775_s16 = smov 0   ;;  %s4884_s0 = inlined_call_operand.vmem [shape: f32[2,18,18,8], index: 0, kind: input, shape index: {}]   ;;  %s4885_s1 = inlined_call_operand.vmem [shape: f32[2,18,18,8], index: 1, kind: input, shape index: {}]   ;;  %s4886_s2 = inlined_call_operand.vmem [shape: f32[2,2,2,24,4], index: 2, kind: input, shape index: {}]   ;;  %s4887_s3 = inlined_call_operand.vmem [shape: f32[1,4], index: 3, kind: input, shape index: {}]   ;;  %s4888_s4 = inlined_call_operand.vmem [shape: f32[2,2,2,16,16,4], index: 4, kind: output, shape index: {}]  }
   0x1   :  { %s3777_s17 = smov 0   ;;  %s3779_s18 = smov 0  }
   0x2   :  { %s3781_s19 = smov 0   ;;  %s3783_s20 = smov 0  }
   0x3   :  { %s3785_s21 = smov 0  }
   0x4 LB: > { %s23_s22 = sadd.s32 1, %s3736_s19  ;;  %s26_s23 = sadd.s32 1, %s3740_s20  ;;  %s3744_s21 = sphi %s3785_s21, %s14_s21   ;;  %s3740_s20 = sphi %s3783_s20, %s4895_s20   ;;  %s3736_s19 = sphi %s3781_s19, %s4894_s19   ;;  %s3732_s18 = sphi %s3779_s18, %s4893_s18   ;;  %s3728_s17 = sphi %s3777_s17, %s4892_s17   ;;  %s3724_s16 = sphi %s3775_s16, %s4891_s16   ;;  %s3720_s15 = sphi %s3773_s15, %s4890_s15  }
   0x5   : > { %p24_p0 = scmp.ge.s32.totalorder %s23_s22, 2  ;;  %s2973_s24 = sadd.s32 4294967295, %s3744_s21  }
   0x6   : > { %p147_p1 = scmp.ne.s32.totalorder %s3724_s16, %s3720_s15  ;;  %p148_p2 = scmp.eq.s32.totalorder %s2973_s24, 3 }
   0x7   : > { %s4897_s22 = smov (%p24_p0, %s23_s22), 0  ;;  %s4899_s23 = smov (!%p24_p0, %s26_s23), %s3740_s20 }
   0x8   : > { %s133_s25 = ssub.s32 %s3736_s19, %s4897_s22  ;;  %p28_p3 = scmp.ge.s32.totalorder %s4899_s23, 2 }
   0x9   : > { %p2979_p4 = scmp.ge.s32.totalorder %s3744_s21, 1  ;;  %p3819_p5 = por %p148_p2, %p147_p1 }
   0xa   : > { %p220_p6 = scmp.lt.s32.totalorder %s3744_s21, 5  ;;  %s4901_s23 = smov (%p28_p3, %s4899_s23), 0 }
   0xb   : > { %s132_s27 = ssub.s32 %s3740_s20, %s4901_s23  ;;  %s137_s29 = sadd.s32 1, %s3724_s16 }
   0xc   : > { %p221_p7 = pnand %p2979_p4, %p220_p6  ;;  %s134_s28 = sor.u32 %s133_s25, %s132_s27 }
   0xd   : > { %p135_p8 = scmp.eq.s32.totalorder %s134_s28, 0  ;;  %s3833_s5 = sshll.u32 (!%p221_p7), %s3728_s17, 3  ;;  %v621_v0 = vld [vmem:[%s4886_s2] sm:$0xff] (!%p221_p7)  ;;  %v622_v1 = vld [vmem:[%s4886_s2 + $0x8] sm:$0xff] (!%p221_p7)  ;;  %v623_v3 = vld [vmem:[%s4886_s2 + $0x10] sm:$0xff] (!%p221_p7)  ;;  %vm480_vm0 = vcmask (!%p221_p7), 64512  }
   0xe   : > { %224 = sbr.rel (%p221_p7) target bundleno = 568 (0x238), region = 36  ;;  %p273_p9 = scmp.lt.s32.totalorder (!%p221_p7), %s3732_s18, 1  ;;  %v3596_v2 = vpack.c.bf16 (!%p221_p7), %v622_v1, %v621_v0  ;;  %v3002_v14 = vld [vmem:[%s4886_s2 + $0x18] sm:$0xff] (!%p221_p7)  ;;  %v3003_v15 = vld [vmem:[%s4886_s2 + $0x20] sm:$0xff] (!%p221_p7)  ;;  %v3004_v19 = vld [vmem:[%s4886_s2 + $0x28] sm:$0xff] (!%p221_p7)  ;;  %vm497_vm1 = vcmask (!%p221_p7), 130048  }
   0xf   : > { %s3830_s30 = scalar_select %p135_p8, %s3724_s16, %s137_s29  }
  0x10   : > { %p275_p10 = scmp.lt.s32.totalorder (!%p221_p7), %s3833_s5, 17  ;;  %3597 = vmatprep.subr.bf16.mxu0 (!%p221_p7), %v3596_v2  ;;  %s3747_s9 = smov (!%p221_p7), 8   ;;  %v3600_v18 = vpack.c.bf16 (!%p221_p7), %v3003_v15, %v3002_v14  ;;  %v3022_v24 = vld [vmem:[%s4886_s2 + $0x30] sm:$0xff] (!%p221_p7)  ;;  %v3023_v25 = vld [vmem:[%s4886_s2 + $0x38] sm:$0xff] (!%p221_p7)  ;;  %v3041_v31 = vld [vmem:[%s4886_s2 + $0x48] sm:$0xff] (!%p221_p7)  ;;  %vm514_vm2 = vcmask (!%p221_p7), 195584  }
  0x11   : > { %3599 = vmatpush3.bf16.msra.mxu0 (!%p221_p7), %v3596_v2  ;;  %v3905_v26 = vpack.c.bf16 (!%p221_p7), %v3023_v25, %v3022_v24  ;;  %v3042_v32 = vld [vmem:[%s4886_s2 + $0x50] sm:$0xff] (!%p221_p7)  ;;  %s3203_s25 = sadd.s32 (!%p221_p7), 8, %s3833_s5  ;;  %v3078_v14 = vld [vmem:[%s4886_s2 + $0x68] sm:$0xff] (!%p221_p7)  ;;  %vm817_vm3 = vcmask (!%p221_p7), 31744   ;;  %s264_s10 = sand.u32 (!%p221_p7), 1, %s3720_s15  }
  0x12   : > { %3360 = vmatprep.subr.mxu0 (!%p221_p7), %v623_v3  ;;  %3601 = vmatprep.subr.bf16.mxu1 (!%p221_p7), %v3600_v18  ;;  %v3922_v33 = vpack.c.bf16 (!%p221_p7), %v3042_v32, %v3041_v31  ;;  %p293_p11 = scmp.lt.s32.totalorder (!%p221_p7), %s3203_s25, 17 }
  0x13   : > { %3603 = vmatpush3.bf16.msra.mxu1 (!%p221_p7), %v3600_v18 }
  0x14   : > { %3390 = vmatprep.subr.mxu1 (!%p221_p7), %v3004_v19 }
  0x15   : > { %s3838_s6 = scalar_select %p273_p9, %s3732_s18, 1  ;;  %3361 = vmatpush3.msra.mxu0 %v623_v3 }
  0x16   : > { %s276_s7 = scalar_select %p275_p10, %s3833_s5, 17  ;;  %3605 = vmatprep.subr.bf16.mxu0 %v3905_v26 }
  0x17   : > { %s3629_s12 = smul.u32 54, %s3838_s6  ;;  %3391 = vmatpush3.msra.mxu1 %v3004_v19  ;;  %s4903_s25 = smov (!%p293_p11, %s3203_s25), 17 }
  0x18   : > { %s3628_s13 = smul.u32 3, %s276_s7  ;;  %s3746_s7 = smov 16   ;;  %3609 = vmatprep.subr.bf16.mxu1 %v3922_v33 }
  0x19   : > { %s3630_s5 = smul.u32 3, %s4903_s25 }
  0x1a   : > { %s279_s14 = sadd.s32 %s3629_s12, %s3628_s13  ;;  %s3201_s13 = sshll.u32 (%p3819_p5), %s3728_s17, 4 }
  0x1b   : > { %s2982_s24 = sshll.u32 %s279_s14, 3  ;;  %s297_s27 = sadd.s32 %s3630_s5, %s3629_s12 }
  0x1c   : > { %s3853_s28 = scalar_lea.vmem %s4884_s0, %s2982_s24  ;;  %s2985_s29 = sshll.u32 %s297_s27, 3 }
  0x1d   : > { %v336_v4 = vld [vmem:[%s3853_s28 + $0x2] sm:$0xff]  ;;  %v337_v6 = vld [vmem:[%s3853_s28 + $0xa] sm:$0xff]  ;;  %v322_v9 = vld [vmem:[%s3853_s28 + $0x19] sm:$0xff]  ;;  %s3953_s11 = scalar_lea.vmem %s4885_s1, %s2985_s29  ;;  %s3190_s14 = sshll.u32 (%p3819_p5), %s3732_s18, 7 }
  0x1e   : > { %v320_v5 = vld [vmem:[%s3853_s28 + $0x1] sm:$0xff]  ;;  %432 = vrot.lane.b32.xlu1 %v336_v4, %s3746_s7  ;;  %v321_v7 = vld [vmem:[%s3853_s28 + $0x9] sm:$0xff]  ;;  %v325_v12 = vld [vmem:[%s3853_s28 + $0x39] sm:$0xff]  ;;  %s2591_s26 = sadd.s32 (%p3819_p5), %s3201_s13, %s3190_s14 }
  0x1f   : > { %368 = vrot.lane.b32.xlu0 %v320_v5, %s3747_s9  ;;  %v323_v8 = vld [vmem:[%s3853_s28 + $0x21] sm:$0xff]  ;;  %v324_v13 = vld [vmem:[%s3853_s28 + $0x31] sm:$0xff]  ;;  %v326_v21 = vld [vmem:[%s3853_s28 + $0x49] sm:$0xff]  ;;  %s3191_s24 = sshll.u32 (%p3819_p5), %s2591_s26, 3 }
  0x20   : > { %v339_v10 = vld [vmem:[%s3853_s28 + $0x22] sm:$0xff]  ;;  %v338_v11 = vld [vmem:[%s3853_s28 + $0x1a] sm:$0xff]  ;;  %v340_v17 = vld [vmem:[%s3853_s28 + $0x32] sm:$0xff]  ;;  %s4742_s27 = scalar_lea.vmem (%p3819_p5), %s4888_s4, %s3191_s24 }
  0x21   : > { %v341_v16 = vld [vmem:[%s3853_s28 + $0x3a] sm:$0xff]  ;;  %v327_v20 = vld [vmem:[%s3853_s28 + $0x51] sm:$0xff]  ;;  %v329_v27 = vld [vmem:[%s3853_s28 + $0x69] sm:$0xff] }
  0x22   : > { %434 = vrot.lane.b32.xlu1 %v337_v6, %s3746_s7  ;;  %v343_v22 = vld [vmem:[%s3853_s28 + $0x52] sm:$0xff]  ;;  %v342_v23 = vld [vmem:[%s3853_s28 + $0x4a] sm:$0xff]  ;;  %v328_v28 = vld [vmem:[%s3853_s28 + $0x61] sm:$0xff] }
  0x23   : > { %370 = vrot.lane.b32.xlu0 %v321_v7, %s3747_s9  ;;  %v345_v29 = vld [vmem:[%s3853_s28 + $0x6a] sm:$0xff]  ;;  %v344_v30 = vld [vmem:[%s3853_s28 + $0x62] sm:$0xff]  ;;  %v330_v35 = vld [vmem:[%s3853_s28 + $0x79] sm:$0xff] }
  0x24   : > { %v331_v34 = vld [vmem:[%s3853_s28 + $0x81] sm:$0xff]  ;;  %v333_v38 = vld [vmem:[%s3853_s28 + $0x99] sm:$0xff]  ;;  %v332_v39 = vld [vmem:[%s3853_s28 + $0x91] sm:$0xff] }
  0x25   : > { %v347_v36 = vld [vmem:[%s3853_s28 + $0x82] sm:$0xff]  ;;  %v346_v37 = vld [vmem:[%s3853_s28 + $0x7a] sm:$0xff]  ;;  %v348_v41 = vld [vmem:[%s3853_s28 + $0x92] sm:$0xff] }
  0x26   : > { %374 = vrot.lane.b32.xlu1 %v323_v8, %s3747_s9  ;;  %v349_v40 = vld [vmem:[%s3853_s28 + $0x9a] sm:$0xff]  ;;  %v335_v42 = vld [vmem:[%s3853_s28 + $0xb1] sm:$0xff]  ;;  %v334_v43 = vld [vmem:[%s3853_s28 + $0xa9] sm:$0xff] }
  0x27   : > { %372 = vrot.lane.b32.xlu0 %v322_v9, %s3747_s9  ;;  %v351_v44 = vld [vmem:[%s3853_s28 + $0xb2] sm:$0xff]  ;;  %v350_v45 = vld [vmem:[%s3853_s28 + $0xaa] sm:$0xff]  ;;  %v535_v47 = vld [vmem:[%s3953_s11 + $0x1] sm:$0xff] }
  0x28   : > { %v536_v46 = vld [vmem:[%s3953_s11 + $0x9] sm:$0xff]  ;;  %v537_v50 = vld [vmem:[%s3953_s11 + $0x19] sm:$0xff]  ;;  %v538_v51 = vld [vmem:[%s3953_s11 + $0x21] sm:$0xff] }
  0x29   : > { %v540_v48 = vld [vmem:[%s3953_s11 + $0xa] sm:$0xff]  ;;  %v539_v49 = vld [vmem:[%s3953_s11 + $0x2] sm:$0xff]  ;;  %v541_v52 = vld [vmem:[%s3953_s11 + $0x1a] sm:$0xff] }
  0x2a   : > { %438 = vrot.lane.b32.xlu1 %v339_v10, %s3746_s7  ;;  %v542_v53 = vld [vmem:[%s3953_s11 + $0x22] sm:$0xff]  ;;  %v306_v3 = vld [vmem:[%s3853_s28 + $0x18] sm:$0xff]  ;;  %v308_v18 = vld [vmem:[%s3853_s28 + $0x30] sm:$0xff] }
  0x2b   : > { %436 = vrot.lane.b32.xlu0 %v338_v11, %s3746_s7  ;;  %v304_v54 = vld [vmem:[%s3853_s28] sm:$0xff]  ;;  %v305_v59 = vld [vmem:[%s3853_s28 + $0x8] sm:$0xff] }
  0x2c   : > { %v307_v2 = vld [vmem:[%s3853_s28 + $0x20] sm:$0xff] }
  0x2d   : > { %v3024_v11 = vld [vmem:[%s4886_s2 + $0x40] sm:$0xff] }
  0x2e   : > { %378 = vrot.lane.b32.xlu1 %v325_v12, %s3747_s9 }
  0x2f   : > { %376 = vrot.lane.b32.xlu0 %v324_v13, %s3747_s9  ;;  %v3077_v13 = vld [vmem:[%s4886_s2 + $0x60] sm:$0xff] }
  0x30   : > { %v4009_v19 = vpack.c.bf16 %v3078_v14, %v3077_v13 }
  0x32   : > { %442 = vrot.lane.b32.xlu1 %v341_v16, %s3746_s7 }
  0x33   : > { %440 = vrot.lane.b32.xlu0 %v340_v17, %s3746_s7  ;;  %v309_v17 = vld [vmem:[%s3853_s28 + $0x38] sm:$0xff] }
  0x36   : > { %382 = vrot.lane.b32.xlu1 %v327_v20, %s3747_s9 }
  0x37   : > { %380 = vrot.lane.b32.xlu0 %v326_v21, %s3747_s9 }
  0x3a   : > { %446 = vrot.lane.b32.xlu1 %v343_v22, %s3746_s7 }
  0x3b   : > { %444 = vrot.lane.b32.xlu0 %v342_v23, %s3746_s7 }
  0x3e   : > { %386 = vrot.lane.b32.xlu1 %v329_v27, %s3747_s9 }
  0x3f   : > { %384 = vrot.lane.b32.xlu0 %v328_v28, %s3747_s9  ;;  %v3043_v28 = vld [vmem:[%s4886_s2 + $0x58] sm:$0xff] }
  0x42   : > { %450 = vrot.lane.b32.xlu1 %v345_v29, %s3746_s7  ;;  %v3096_v29 = vld [vmem:[%s4886_s2 + $0x78] sm:$0xff] }
  0x43   : > { %448 = vrot.lane.b32.xlu0 %v344_v30, %s3746_s7  ;;  %v3097_v30 = vld [vmem:[%s4886_s2 + $0x80] sm:$0xff] }
  0x46   : > { %390 = vrot.lane.b32.xlu1 %v331_v34, %s3747_s9  ;;  %v311_v34 = vld [vmem:[%s3853_s28 + $0x50] sm:$0xff] }
  0x47   : > { %388 = vrot.lane.b32.xlu0 %v330_v35, %s3747_s9  ;;  %v310_v35 = vld [vmem:[%s3853_s28 + $0x48] sm:$0xff] }
  0x4a   : > { %454 = vrot.lane.b32.xlu1 %v347_v36, %s3746_s7  ;;  %v4042_v36 = vpack.c.bf16 %v3097_v30, %v3096_v29 }
  0x4b   : > { %452 = vrot.lane.b32.xlu0 %v346_v37, %s3746_s7 }
  0x4e   : > { %394 = vrot.lane.b32.xlu1 %v333_v38, %s3747_s9 }
  0x4f   : > { %392 = vrot.lane.b32.xlu0 %v332_v39, %s3747_s9 }
  0x52   : > { %458 = vrot.lane.b32.xlu1 %v349_v40, %s3746_s7 }
  0x53   : > { %456 = vrot.lane.b32.xlu0 %v348_v41, %s3746_s7 }
  0x56   : > { %398 = vrot.lane.b32.xlu1 %v335_v42, %s3747_s9 }
  0x57   : > { %396 = vrot.lane.b32.xlu0 %v334_v43, %s3747_s9 }
  0x5a   : > { %462 = vrot.lane.b32.xlu1 %v351_v44, %s3746_s7 }
  0x5b   : > { %460 = vrot.lane.b32.xlu0 %v350_v45, %s3746_s7 }
  0x5e   : > { %549 = vrot.lane.b32.xlu1 %v536_v46, %s3747_s9  ;;  %v313_v46 = vld [vmem:[%s3853_s28 + $0x68] sm:$0xff] }
  0x5f   : > { %547 = vrot.lane.b32.xlu0 %v535_v47, %s3747_s9  ;;  %v312_v47 = vld [vmem:[%s3853_s28 + $0x60] sm:$0xff] }
  0x62   : > { %565 = vrot.lane.b32.xlu1 %v540_v48, %s3746_s7 }
  0x63   : > { %563 = vrot.lane.b32.xlu0 %v539_v49, %s3746_s7 }
  0x66   : > { %553 = vrot.lane.b32.xlu1 %v538_v51, %s3747_s9 }
  0x67   : > { %551 = vrot.lane.b32.xlu0 %v537_v50, %s3747_s9 }
  0x6a   : > { %569 = vrot.lane.b32.xlu1 %v542_v53, %s3746_s7 }
  0x6b   : > { %567 = vrot.lane.b32.xlu0 %v541_v52, %s3746_s7 }
  0x90   : > { %v433_v55 = vpop.permute.xlu1 %432 }
  0x91   : > { %v369_v56 = vpop.permute.xlu0 %368 }
  0x92   : > { %v481_v57 = vsel %vm480_vm0, %v304_v54, %v369_v56 }
  0x93   : > { %v498_v58 = vsel %vm497_vm1, %v481_v57, %v433_v55 }
  0x94   : > { %515 = vst.msk [vmem:[#allocation2] sm:$0xff] %vm514_vm2, %v498_v58  ;;  %v435_v60 = vpop.permute.xlu1 %434  ;;  %v315_v58 = vld [vmem:[%s3853_s28 + $0x80] sm:$0xff] }
  0x95   : > { %v371_v61 = vpop.permute.xlu0 %370 }
  0x96   : > { %v482_v62 = vsel %vm480_vm0, %v305_v59, %v371_v61  ;;  %v314_v59 = vld [vmem:[%s3853_s28 + $0x78] sm:$0xff] }
  0x97   : > { %v499_v63 = vsel %vm497_vm1, %v482_v62, %v435_v60 }
  0x98   : > { %516 = vst.msk [vmem:[#allocation2 + $0x8] sm:$0xff] %vm514_vm2, %v499_v63  ;;  %v375_v0 = vpop.permute.xlu1 %374 }
  0x99   : > { %v373_v1 = vpop.permute.xlu0 %372  ;;  %v484_v5 = vsel %vm480_vm0, %v307_v2, %v375_v0 }
  0x9a   : > { %v483_v6 = vsel %vm480_vm0, %v306_v3, %v373_v1 }
  0x9b   : > { %v3983_v4 = vld [vmem:[#allocation2] sm:$0xff] }
  0x9c   : > { %3362 = vmatprep.mubr.msk.f32.mxu0 %vm514_vm2, %v3983_v4  ;;  %v439_v7 = vpop.permute.xlu1 %438 }
  0x9d   : > { %v437_v8 = vpop.permute.xlu0 %436  ;;  %v501_v9 = vsel %vm497_vm1, %v484_v5, %v439_v7  ;;  %v317_v7 = vld [vmem:[%s3853_s28 + $0x98] sm:$0xff] }
  0x9e   : > { %v500_v10 = vsel %vm497_vm1, %v483_v6, %v437_v8  ;;  %518 = vst.msk [vmem:[#allocation2 + $0x18] sm:$0xff] %vm514_vm2, %v501_v9  ;;  %v316_v8 = vld [vmem:[%s3853_s28 + $0x90] sm:$0xff] }
  0x9f   : > { %517 = vst.msk [vmem:[#allocation2 + $0x10] sm:$0xff] %vm514_vm2, %v500_v10  ;;  %v3996_v12 = vld [vmem:[#allocation2 + $0x8] sm:$0xff] }
  0xa0   : > { %3363 = vmatmul.mubr.msk.f32.vlgmr.msra.gmra.mrb[0].mxu0 %vm514_vm2, %v3996_v12  ;;  %v379_v15 = vpop.permute.xlu1 %378 }
  0xa1   : > { %v377_v16 = vpop.permute.xlu0 %376  ;;  %3607 = vmatpush3.bf16.msra.mxu0 %v3905_v26  ;;  %v486_v20 = vsel %vm480_vm0, %v309_v17, %v379_v15 }
  0xa2   : > { %3420 = vmatprep.subr.mxu0 %v3024_v11  ;;  %v485_v21 = vsel %vm480_vm0, %v308_v18, %v377_v16 }
  0xa4   : > { %v443_v22 = vpop.permute.xlu1 %442 }
  0xa5   : > { %v441_v23 = vpop.permute.xlu0 %440  ;;  %3421 = vmatpush3.msra.mxu0 %v3024_v11  ;;  %v503_v24 = vsel %vm497_vm1, %v486_v20, %v443_v22  ;;  %v4017_v26 = vld [vmem:[#allocation2 + $0x18] sm:$0xff]  ;;  %v318_v22 = vld [vmem:[%s3853_s28 + $0xa8] sm:$0xff] }
  0xa6   : > { %v502_v25 = vsel %vm497_vm1, %v485_v21, %v441_v23  ;;  %v4015_v27 = vld [vmem:[#allocation2 + $0x10] sm:$0xff]  ;;  %3613 = vmatprep.subr.bf16.mxu0 %v4009_v19  ;;  %520 = vst.msk [vmem:[#allocation2 + $0x28] sm:$0xff] %vm514_vm2, %v503_v24 }
  0xa7   : > { %519 = vst.msk [vmem:[#allocation2 + $0x20] sm:$0xff] %vm514_vm2, %v502_v25  ;;  %3365 = vmatprep.mubr.msk.f32.mxu0 %vm514_vm2, %v4015_v27  ;;  %3392 = vmatprep.mubr.msk.f32.mxu1 %vm514_vm2, %v4015_v27  ;;  %v319_v21 = vld [vmem:[%s3853_s28 + $0xb0] sm:$0xff] }
  0xa8   : > { %3366 = vmatmul.mubr.msk.f32.gmra.mrb[2].mxu0 %vm514_vm2, %v4017_v26  ;;  %3393 = vmatmul.mubr.msk.f32.vlgmr.msra.gmra.mrb[0].mxu1 %vm514_vm2, %v4017_v26  ;;  %v383_v31 = vpop.permute.xlu1 %382 }
  0xa9   : > { %v381_v32 = vpop.permute.xlu0 %380  ;;  %3611 = vmatpush3.bf16.msra.mxu1 %v3922_v33  ;;  %v488_v37 = vsel %vm480_vm0, %v311_v34, %v383_v31 }
  0xaa   : > { %3450 = vmatprep.subr.mxu1 %v3043_v28  ;;  %v487_v38 = vsel %vm480_vm0, %v310_v35, %v381_v32 }
  0xac   : > { %v447_v39 = vpop.permute.xlu1 %446 }
  0xad   : > { %v445_v40 = vpop.permute.xlu0 %444  ;;  %3451 = vmatpush3.msra.mxu1 %v3043_v28  ;;  %v505_v41 = vsel %vm497_vm1, %v488_v37, %v447_v39  ;;  %v4050_v33 = vld [vmem:[#allocation2 + $0x28] sm:$0xff] }
  0xae   : > { %v504_v42 = vsel %vm497_vm1, %v487_v38, %v445_v40  ;;  %v4048_v43 = vld [vmem:[#allocation2 + $0x20] sm:$0xff]  ;;  %3617 = vmatprep.subr.bf16.mxu1 %v4042_v36  ;;  %522 = vst.msk [vmem:[#allocation2 + $0x38] sm:$0xff] %vm514_vm2, %v505_v41  ;;  %v532_v37 = vld [vmem:[%s3953_s11 + $0x8] sm:$0xff] }
  0xaf   : > { %521 = vst.msk [vmem:[#allocation2 + $0x30] sm:$0xff] %vm514_vm2, %v504_v42  ;;  %3368 = vmatprep.mubr.msk.f32.mxu0 %vm514_vm2, %v4048_v43  ;;  %3395 = vmatprep.mubr.msk.f32.mxu1 %vm514_vm2, %v4048_v43  ;;  %v531_v38 = vld [vmem:[%s3953_s11] sm:$0xff] }
  0xb0   : > { %3369 = vmatmul.mubr.msk.f32.gmra.mrb[4].mxu0 %vm514_vm2, %v4050_v33  ;;  %3396 = vmatmul.mubr.msk.f32.gmra.mrb[2].mxu1 %vm514_vm2, %v4050_v33  ;;  %v387_v44 = vpop.permute.xlu1 %386 }
  0xb1   : > { %v385_v45 = vpop.permute.xlu0 %384  ;;  %v490_v48 = vsel %vm480_vm0, %v313_v46, %v387_v44 }
  0xb2   : > { %v489_v49 = vsel %vm480_vm0, %v312_v47, %v385_v45 }
  0xb4   : > { %v451_v50 = vpop.permute.xlu1 %450 }
  0xb5   : > { %v449_v51 = vpop.permute.xlu0 %448  ;;  %v507_v52 = vsel %vm497_vm1, %v490_v48, %v451_v50  ;;  %v4071_v55 = vld [vmem:[#allocation2 + $0x38] sm:$0xff] }
  0xb6   : > { %v506_v53 = vsel %vm497_vm1, %v489_v49, %v449_v51  ;;  %v4069_v54 = vld [vmem:[#allocation2 + $0x30] sm:$0xff]  ;;  %524 = vst.msk [vmem:[#allocation2 + $0x48] sm:$0xff] %vm514_vm2, %v507_v52  ;;  %v533_v48 = vld [vmem:[%s3953_s11 + $0x18] sm:$0xff]  ;;  %v534_v49 = vld [vmem:[%s3953_s11 + $0x20] sm:$0xff]  ;;  %s2980_s11 = sshll.u32 %s264_s10, 9 }
  0xb7   : > { %523 = vst.msk [vmem:[#allocation2 + $0x40] sm:$0xff] %vm514_vm2, %v506_v53  ;;  %3371 = vmatprep.mubr.msk.f32.mxu0 %vm514_vm2, %v4069_v54  ;;  %3398 = vmatprep.mubr.msk.f32.mxu1 %vm514_vm2, %v4069_v54  ;;  %v3079_v52 = vld [vmem:[%s4886_s2 + $0x70] sm:$0xff]  ;;  %s4411_s15 = scalar_lea.vmem [#allocation4], %s2980_s11 }
  0xb8   : > { %3372 = vmatmul.mubr.msk.f32.gmra.mrb[6].mxu0 %vm514_vm2, %v4071_v55  ;;  %3399 = vmatmul.mubr.msk.f32.gmra.mrb[4].mxu1 %vm514_vm2, %v4071_v55  ;;  %v391_v56 = vpop.permute.xlu1 %390 }
  0xb9   : > { %v389_v57 = vpop.permute.xlu0 %388  ;;  %v492_v60 = vsel %vm480_vm0, %v315_v58, %v391_v56 }
  0xba   : > { %v491_v61 = vsel %vm480_vm0, %v314_v59, %v389_v57  ;;  %v3132_v57 = vld [vmem:[%s4886_s2 + $0x90] sm:$0xff] }
  0xbc   : > { %v455_v62 = vpop.permute.xlu1 %454 }
  0xbd   : > { %v453_v63 = vpop.permute.xlu0 %452  ;;  %v509_v0 = vsel %vm497_vm1, %v492_v60, %v455_v62  ;;  %v4091_v3 = vld [vmem:[#allocation2 + $0x48] sm:$0xff] }
  0xbe   : > { %v508_v1 = vsel %vm497_vm1, %v491_v61, %v453_v63  ;;  %v4089_v2 = vld [vmem:[#allocation2 + $0x40] sm:$0xff]  ;;  %526 = vst.msk [vmem:[#allocation2 + $0x58] sm:$0xff] %vm514_vm2, %v509_v0  ;;  %v3151_v0 = vld [vmem:[%s4886_s2 + $0xa8] sm:$0xff] }
  0xbf   : > { %525 = vst.msk [vmem:[#allocation2 + $0x50] sm:$0xff] %vm514_vm2, %v508_v1  ;;  %3374 = vmatprep.mubr.msk.f32.mxu0 %vm514_vm2, %v4089_v2  ;;  %3401 = vmatprep.mubr.msk.f32.mxu1 %vm514_vm2, %v4089_v2  ;;  %v3152_v1 = vld [vmem:[%s4886_s2 + $0xb0] sm:$0xff] }
  0xc0   : > { %3375 = vmatmul.mubr.msk.f32.gmra.mrb[8].mxu0 %vm514_vm2, %v4091_v3  ;;  %3402 = vmatmul.mubr.msk.f32.gmra.mrb[6].mxu1 %vm514_vm2, %v4091_v3  ;;  %v395_v5 = vpop.permute.xlu1 %394 }
  0xc1   : > { %v393_v6 = vpop.permute.xlu0 %392  ;;  %v494_v9 = vsel %vm480_vm0, %v317_v7, %v395_v5  ;;  %v3624_v5 = vpack.c.bf16 %v3152_v1, %v3151_v0 }
  0xc2   : > { %v493_v10 = vsel %vm480_vm0, %v316_v8, %v393_v6  ;;  %v3153_v6 = vld [vmem:[%s4886_s2 + $0xb8] sm:$0xff] }
  0xc4   : > { %v459_v11 = vpop.permute.xlu1 %458 }
  0xc5   : > { %v457_v13 = vpop.permute.xlu0 %456  ;;  %v511_v14 = vsel %vm497_vm1, %v494_v9, %v459_v11  ;;  %v4111_v17 = vld [vmem:[#allocation2 + $0x58] sm:$0xff] }
  0xc6   : > { %v510_v15 = vsel %vm497_vm1, %v493_v10, %v457_v13  ;;  %v4109_v16 = vld [vmem:[#allocation2 + $0x50] sm:$0xff]  ;;  %528 = vst.msk [vmem:[#allocation2 + $0x68] sm:$0xff] %vm514_vm2, %v511_v14 }
  0xc7   : > { %527 = vst.msk [vmem:[#allocation2 + $0x60] sm:$0xff] %vm514_vm2, %v510_v15  ;;  %3377 = vmatprep.mubr.msk.f32.mxu0 %vm514_vm2, %v4109_v16  ;;  %3404 = vmatprep.mubr.msk.f32.mxu1 %vm514_vm2, %v4109_v16  ;;  %v4403_v15 = vld [vmem:[%s4887_s3] ss:$0 sm:$0xff] }
  0xc8   : > { %3378 = vmatmul.mubr.msk.f32.gmra.mrb[10].mxu0 %vm514_vm2, %v4111_v17  ;;  %3405 = vmatmul.mubr.msk.f32.gmra.mrb[8].mxu1 %vm514_vm2, %v4111_v17  ;;  %v399_v18 = vpop.permute.xlu1 %398 }
  0xc9   : > { %v397_v20 = vpop.permute.xlu0 %396  ;;  %v496_v23 = vsel %vm480_vm0, %v319_v21, %v399_v18 }
  0xca   : > { %v495_v24 = vsel %vm480_vm0, %v318_v22, %v397_v20 }
  0xcc   : > { %v463_v25 = vpop.permute.xlu1 %462 }
  0xcd   : > { %v461_v28 = vpop.permute.xlu0 %460  ;;  %v513_v29 = vsel %vm497_vm1, %v496_v23, %v463_v25  ;;  %v4131_v32 = vld [vmem:[#allocation2 + $0x68] sm:$0xff] }
  0xce   : > { %v512_v30 = vsel %vm497_vm1, %v495_v24, %v461_v28  ;;  %v4129_v31 = vld [vmem:[#allocation2 + $0x60] sm:$0xff]  ;;  %530 = vst.msk [vmem:[#allocation2 + $0x78] sm:$0xff] %vm514_vm2, %v513_v29 }
  0xcf   : > { %529 = vst.msk [vmem:[#allocation2 + $0x70] sm:$0xff] %vm514_vm2, %v512_v30  ;;  %3380 = vmatprep.mubr.msk.f32.mxu0 %vm514_vm2, %v4129_v31  ;;  %3407 = vmatprep.mubr.msk.f32.mxu1 %vm514_vm2, %v4129_v31 }
  0xd0   : > { %3381 = vmatmul.mubr.msk.f32.gmra.mrb[12].mxu0 %vm514_vm2, %v4131_v32  ;;  %3408 = vmatmul.mubr.msk.f32.gmra.mrb[10].mxu1 %vm514_vm2, %v4131_v32  ;;  %v550_v34 = vpop.permute.xlu1 %549 }
  0xd1   : > { %v548_v35 = vpop.permute.xlu0 %547  ;;  %v576_v39 = vsel %vm480_vm0, %v532_v37, %v550_v34 }
  0xd2   : > { %v575_v40 = vsel %vm480_vm0, %v531_v38, %v548_v35 }
  0xd4   : > { %v566_v41 = vpop.permute.xlu1 %565 }
  0xd5   : > { %v564_v42 = vpop.permute.xlu0 %563  ;;  %v580_v44 = vsel %vm497_vm1, %v576_v39, %v566_v41  ;;  %v4151_v47 = vld [vmem:[#allocation2 + $0x78] sm:$0xff] }
  0xd6   : > { %v579_v45 = vsel %vm497_vm1, %v575_v40, %v564_v42  ;;  %v4149_v46 = vld [vmem:[#allocation2 + $0x70] sm:$0xff]  ;;  %585 = vst.msk [vmem:[#allocation2 + $0x88] sm:$0xff] %vm514_vm2, %v580_v44 }
  0xd7   : > { %584 = vst.msk [vmem:[#allocation2 + $0x80] sm:$0xff] %vm514_vm2, %v579_v45  ;;  %3383 = vmatprep.mubr.msk.f32.mxu0 %vm514_vm2, %v4149_v46  ;;  %3410 = vmatprep.mubr.msk.f32.mxu1 %vm514_vm2, %v4149_v46 }
  0xd8   : > { %3384 = vmatmul.mubr.msk.f32.gmra.mrb[14].mxu0 %vm514_vm2, %v4151_v47  ;;  %3411 = vmatmul.mubr.msk.f32.gmra.mrb[12].mxu1 %vm514_vm2, %v4151_v47  ;;  %v554_v51 = vpop.permute.xlu1 %553 }
  0xd9   : > { %3422 = vmatprep.mubr.msk.f32.mxu0 %vm514_vm2, %v3983_v4  ;;  %v552_v50 = vpop.permute.xlu0 %551  ;;  %v578_v56 = vsel %vm480_vm0, %v534_v49, %v554_v51  ;;  %v3133_v4 = vld [vmem:[%s4886_s2 + $0x98] sm:$0xff] }
  0xda   : > { %v577_v53 = vsel %vm480_vm0, %v533_v48, %v552_v50  ;;  %v3620_v63 = vpack.c.bf16 %v3133_v4, %v3132_v57 }
  0xdc   : > { %3423 = vmatmul.mubr.msk.f32.vlgmr.msra.gmra.mrb[16].mxu0 %vm514_vm2, %v3996_v12  ;;  %v570_v59 = vpop.permute.xlu1 %569 }
  0xdd   : > { %3615 = vmatpush3.bf16.msra.mxu0 %v4009_v19  ;;  %3425 = vmatprep.mubr.msk.f32.mxu0 %vm514_vm2, %v4015_v27  ;;  %v568_v58 = vpop.permute.xlu0 %567  ;;  %v4185_v61 = vld [vmem:[#allocation2 + $0x88] sm:$0xff]  ;;  %v582_v62 = vsel %vm497_vm1, %v578_v56, %v570_v59 }
  0xde   : > { %v4183_v60 = vld [vmem:[#allocation2 + $0x80] sm:$0xff]  ;;  %3480 = vmatprep.subr.mxu0 %v3079_v52  ;;  %v581_v12 = vsel %vm497_vm1, %v577_v53, %v568_v58  ;;  %587 = vst.msk [vmem:[#allocation2 + $0x98] sm:$0xff] %vm514_vm2, %v582_v62  ;;  %v3098_v19 = vld [vmem:[%s4886_s2 + $0x88] sm:$0xff] }
  0xdf   : > { %3413 = vmatprep.mubr.msk.f32.mxu1 %vm514_vm2, %v4183_v60  ;;  %586 = vst.msk [vmem:[#allocation2 + $0x90] sm:$0xff] %vm514_vm2, %v581_v12 }
  0xe0   : > { %3414 = vmatmul.mubr.msk.f32.gmra.mrb[14].mxu1 %vm514_vm2, %v4185_v61  ;;  %3426 = vmatmul.mubr.msk.f32.gmra.mrb[18].mxu0 %vm514_vm2, %v4017_v26 }
  0xe1   : > { %3428 = vmatprep.mubr.msk.f32.mxu0 %vm514_vm2, %v4048_v43  ;;  %3452 = vmatprep.mubr.msk.f32.mxu1 %vm514_vm2, %v4015_v27 }
  0xe2   : > { %3481 = vmatpush3.msra.mxu0 %v3079_v52 }
  0xe3   : > { %3621 = vmatprep.subr.bf16.mxu0 %v3620_v63 }
  0xe4   : > { %3429 = vmatmul.mubr.msk.f32.gmra.mrb[20].mxu0 %vm514_vm2, %v4050_v33  ;;  %3453 = vmatmul.mubr.msk.f32.vlgmr.msra.gmra.mrb[16].mxu1 %vm514_vm2, %v4017_v26 }
  0xe5   : > { %3619 = vmatpush3.bf16.msra.mxu1 %v4042_v36  ;;  %3431 = vmatprep.mubr.msk.f32.mxu0 %vm514_vm2, %v4069_v54  ;;  %v3134_v36 = vld [vmem:[%s4886_s2 + $0xa0] sm:$0xff]  ;;  %v1616_v8 = vld [vmem:[#allocation2 + $0x98] sm:$0xff] }
  0xe6   : > { %3455 = vmatprep.mubr.msk.f32.mxu1 %vm514_vm2, %v4048_v43  ;;  %3510 = vmatprep.subr.mxu1 %v3098_v19  ;;  %v1615_v7 = vld [vmem:[#allocation2 + $0x90] sm:$0xff] }
  0xe8   : > { %3432 = vmatmul.mubr.msk.f32.gmra.mrb[22].mxu0 %vm514_vm2, %v4071_v55  ;;  %3456 = vmatmul.mubr.msk.f32.gmra.mrb[18].mxu1 %vm514_vm2, %v4050_v33 }
  0xe9   : > { %3434 = vmatprep.mubr.msk.f32.mxu0 %vm514_vm2, %v4089_v2  ;;  %3458 = vmatprep.mubr.msk.f32.mxu1 %vm514_vm2, %v4069_v54 }
  0xea   : > { %3511 = vmatpush3.msra.mxu1 %v3098_v19 }
  0xeb   : > { %3625 = vmatprep.subr.bf16.mxu1 %v3624_v5 }
  0xec   : > { %3435 = vmatmul.mubr.msk.f32.gmra.mrb[24].mxu0 %vm514_vm2, %v4091_v3  ;;  %3459 = vmatmul.mubr.msk.f32.gmra.mrb[20].mxu1 %vm514_vm2, %v4071_v55 }
  0xed   : > { %3437 = vmatprep.mubr.msk.f32.mxu0 %vm514_vm2, %v4109_v16  ;;  %3461 = vmatprep.mubr.msk.f32.mxu1 %vm514_vm2, %v4089_v2 }
  0xf0   : > { %3438 = vmatmul.mubr.msk.f32.gmra.mrb[26].mxu0 %vm514_vm2, %v4111_v17  ;;  %3462 = vmatmul.mubr.msk.f32.gmra.mrb[22].mxu1 %vm514_vm2, %v4091_v3 }
  0xf1   : > { %3440 = vmatprep.mubr.msk.f32.mxu0 %vm514_vm2, %v4129_v31  ;;  %3464 = vmatprep.mubr.msk.f32.mxu1 %vm514_vm2, %v4109_v16 }
  0xf4   : > { %3441 = vmatmul.mubr.msk.f32.gmra.mrb[28].mxu0 %vm514_vm2, %v4131_v32  ;;  %3465 = vmatmul.mubr.msk.f32.gmra.mrb[24].mxu1 %vm514_vm2, %v4111_v17 }
  0xf5   : > { %3443 = vmatprep.mubr.msk.f32.mxu0 %vm514_vm2, %v4149_v46  ;;  %3467 = vmatprep.mubr.msk.f32.mxu1 %vm514_vm2, %v4129_v31 }
  0xf8   : > { %3444 = vmatmul.mubr.msk.f32.gmra.mrb[30].mxu0 %vm514_vm2, %v4151_v47  ;;  %3468 = vmatmul.mubr.msk.f32.gmra.mrb[26].mxu1 %vm514_vm2, %v4131_v32 }
  0xf9   : > { %3470 = vmatprep.mubr.msk.f32.mxu1 %vm514_vm2, %v4149_v46  ;;  %3482 = vmatprep.mubr.msk.f32.mxu0 %vm514_vm2, %v4015_v27 }
  0xfc   : > { %3471 = vmatmul.mubr.msk.f32.gmra.mrb[28].mxu1 %vm514_vm2, %v4151_v47  ;;  %3483 = vmatmul.mubr.msk.f32.vlgmr.msra.gmra.mrb[32].mxu0 %vm514_vm2, %v4017_v26 }
  0xfd   : > { %3623 = vmatpush3.bf16.msra.mxu0 %v3620_v63  ;;  %3473 = vmatprep.mubr.msk.f32.mxu1 %vm514_vm2, %v4183_v60 }
  0xfe   : > { %3485 = vmatprep.mubr.msk.f32.mxu0 %vm514_vm2, %v4048_v43  ;;  %3540 = vmatprep.subr.mxu0 %v3134_v36 }
 0x100   : > { %3474 = vmatmul.mubr.msk.f32.gmra.mrb[30].mxu1 %vm514_vm2, %v4185_v61  ;;  %3486 = vmatmul.mubr.msk.f32.gmra.mrb[34].mxu0 %vm514_vm2, %v4050_v33 }
 0x101   : > { %3488 = vmatprep.mubr.msk.f32.mxu0 %vm514_vm2, %v4069_v54  ;;  %3512 = vmatprep.mubr.msk.f32.mxu1 %vm514_vm2, %v4048_v43 }
 0x102   : > { %3541 = vmatpush3.msra.mxu0 %v3134_v36 }
 0x104   : > { %3489 = vmatmul.mubr.msk.f32.gmra.mrb[36].mxu0 %vm514_vm2, %v4071_v55  ;;  %3513 = vmatmul.mubr.msk.f32.vlgmr.msra.gmra.mrb[32].mxu1 %vm514_vm2, %v4050_v33 }
 0x105   : > { %3627 = vmatpush3.bf16.msra.mxu1 %v3624_v5  ;;  %3491 = vmatprep.mubr.msk.f32.mxu0 %vm514_vm2, %v4089_v2 }
 0x106   : > { %3515 = vmatprep.mubr.msk.f32.mxu1 %vm514_vm2, %v4069_v54  ;;  %3570 = vmatprep.subr.mxu1 %v3153_v6 }
 0x108   : > { %3492 = vmatmul.mubr.msk.f32.gmra.mrb[38].mxu0 %vm514_vm2, %v4091_v3  ;;  %3516 = vmatmul.mubr.msk.f32.gmra.mrb[34].mxu1 %vm514_vm2, %v4071_v55 }
 0x109   : > { %3494 = vmatprep.mubr.msk.f32.mxu0 %vm514_vm2, %v4109_v16  ;;  %3518 = vmatprep.mubr.msk.f32.mxu1 %vm514_vm2, %v4089_v2 }
 0x10a   : > { %3571 = vmatpush3.msra.mxu1 %v3153_v6 }
 0x10c   : > { %3495 = vmatmul.mubr.msk.f32.gmra.mrb[40].mxu0 %vm514_vm2, %v4111_v17  ;;  %3519 = vmatmul.mubr.msk.f32.gmra.mrb[36].mxu1 %vm514_vm2, %v4091_v3 }
 0x10d   : > { %3497 = vmatprep.mubr.msk.f32.mxu0 %vm514_vm2, %v4129_v31  ;;  %3521 = vmatprep.mubr.msk.f32.mxu1 %vm514_vm2, %v4109_v16 }
 0x110   : > { %3498 = vmatmul.mubr.msk.f32.gmra.mrb[42].mxu0 %vm514_vm2, %v4131_v32  ;;  %3522 = vmatmul.mubr.msk.f32.gmra.mrb[38].mxu1 %vm514_vm2, %v4111_v17 }
 0x111   : > { %3500 = vmatprep.mubr.msk.f32.mxu0 %vm514_vm2, %v4149_v46  ;;  %3524 = vmatprep.mubr.msk.f32.mxu1 %vm514_vm2, %v4129_v31 }
 0x114   : > { %3501 = vmatmul.mubr.msk.f32.gmra.mrb[44].mxu0 %vm514_vm2, %v4151_v47  ;;  %3525 = vmatmul.mubr.msk.f32.gmra.mrb[40].mxu1 %vm514_vm2, %v4131_v32 }
 0x115   : > { %3503 = vmatprep.mubr.msk.f32.mxu0 %vm514_vm2, %v4183_v60  ;;  %3527 = vmatprep.mubr.msk.f32.mxu1 %vm514_vm2, %v4149_v46 }
 0x118   : > { %3504 = vmatmul.mubr.msk.f32.gmra.mrb[46].mxu0 %vm514_vm2, %v4185_v61  ;;  %3528 = vmatmul.mubr.msk.f32.gmra.mrb[42].mxu1 %vm514_vm2, %v4151_v47 }
 0x119   : > { %3530 = vmatprep.mubr.msk.f32.mxu1 %vm514_vm2, %v4183_v60  ;;  %3542 = vmatprep.mubr.msk.f32.mxu0 %vm514_vm2, %v4015_v27 }
 0x11c   : > { %3531 = vmatmul.mubr.msk.f32.gmra.mrb[44].mxu1 %vm514_vm2, %v4185_v61  ;;  %3543 = vmatmul.mubr.msk.f32.vlgmr.msra.gmra.mrb[48].mxu0 %vm514_vm2, %v4017_v26 }
 0x11d   : > { %3533 = vmatprep.mubr.msk.f32.mxu1 %vm514_vm2, %v1615_v7  ;;  %3545 = vmatprep.mubr.msk.f32.mxu0 %vm514_vm2, %v4048_v43 }
 0x120   : > { %3534 = vmatmul.mubr.msk.f32.gmra.mrb[46].mxu1 %vm514_vm2, %v1616_v8  ;;  %3546 = vmatmul.mubr.msk.f32.gmra.mrb[50].mxu0 %vm514_vm2, %v4050_v33 }
 0x121   : > { %3548 = vmatprep.mubr.msk.f32.mxu0 %vm514_vm2, %v4069_v54  ;;  %3572 = vmatprep.mubr.msk.f32.mxu1 %vm514_vm2, %v4048_v43 }
 0x124   : > { %3549 = vmatmul.mubr.msk.f32.gmra.mrb[52].mxu0 %vm514_vm2, %v4071_v55  ;;  %3573 = vmatmul.mubr.msk.f32.vlgmr.msra.gmra.mrb[48].mxu1 %vm514_vm2, %v4050_v33 }
 0x125   : > { %3551 = vmatprep.mubr.msk.f32.mxu0 %vm514_vm2, %v4089_v2  ;;  %3575 = vmatprep.mubr.msk.f32.mxu1 %vm514_vm2, %v4069_v54 }
 0x128   : > { %3552 = vmatmul.mubr.msk.f32.gmra.mrb[54].mxu0 %vm514_vm2, %v4091_v3  ;;  %3576 = vmatmul.mubr.msk.f32.gmra.mrb[50].mxu1 %vm514_vm2, %v4071_v55 }
 0x129   : > { %3554 = vmatprep.mubr.msk.f32.mxu0 %vm514_vm2, %v4109_v16  ;;  %3578 = vmatprep.mubr.msk.f32.mxu1 %vm514_vm2, %v4089_v2 }
 0x12c   : > { %3555 = vmatmul.mubr.msk.f32.gmra.mrb[56].mxu0 %vm514_vm2, %v4111_v17  ;;  %3579 = vmatmul.mubr.msk.f32.gmra.mrb[52].mxu1 %vm514_vm2, %v4091_v3 }
 0x12d   : > { %3557 = vmatprep.mubr.msk.f32.mxu0 %vm514_vm2, %v4129_v31  ;;  %3581 = vmatprep.mubr.msk.f32.mxu1 %vm514_vm2, %v4109_v16 }
 0x130   : > { %3558 = vmatmul.mubr.msk.f32.gmra.mrb[58].mxu0 %vm514_vm2, %v4131_v32  ;;  %3582 = vmatmul.mubr.msk.f32.gmra.mrb[54].mxu1 %vm514_vm2, %v4111_v17 }
 0x131   : > { %3560 = vmatprep.mubr.msk.f32.mxu0 %vm514_vm2, %v4149_v46  ;;  %3584 = vmatprep.mubr.msk.f32.mxu1 %vm514_vm2, %v4129_v31 }
 0x134   : > { %3561 = vmatmul.mubr.msk.f32.gmra.mrb[60].mxu0 %vm514_vm2, %v4151_v47  ;;  %3585 = vmatmul.mubr.msk.f32.gmra.mrb[56].mxu1 %vm514_vm2, %v4131_v32 }
 0x135   : > { %3563 = vmatprep.mubr.msk.f32.mxu0 %vm514_vm2, %v4183_v60  ;;  %3587 = vmatprep.mubr.msk.f32.mxu1 %vm514_vm2, %v4149_v46 }
 0x138   : > { %3564 = vmatmul.mubr.msk.f32.gmra.mrb[62].mxu0 %vm514_vm2, %v4185_v61  ;;  %3588 = vmatmul.mubr.msk.f32.gmra.mrb[58].mxu1 %vm514_vm2, %v4151_v47 }
 0x139   : > { %3590 = vmatprep.mubr.msk.f32.mxu1 %vm514_vm2, %v4183_v60 }
 0x13c   : > { %3591 = vmatmul.mubr.msk.f32.gmra.mrb[60].mxu1 %vm514_vm2, %v4185_v61 }
 0x13d   : > { %3593 = vmatprep.mubr.msk.f32.mxu1 %vm514_vm2, %v1615_v7 }
 0x140   : > { %3594 = vmatmul.mubr.msk.f32.gmra.mrb[62].mxu1 %vm514_vm2, %v1616_v8 }
 0x173   : > { %v3364_v27 = vpop.f32.mrb[0].mxu0 }
 0x174   : > { %819 = vst.msk [vmem:[#allocation3 + $0x8] sm:$0xff] %vm817_vm3, %v3364_v27  ;;  %v738_v26 = vpop.f32.mrb[1].mxu0 }
 0x175   : > { %818 = vst.msk [vmem:[#allocation3] sm:$0xff] %vm817_vm3, %v738_v26 }
 0x17b   : > { %v3367_v43 = vpop.f32.mrb[2].mxu0  ;;  %v835_v33 = vld [vmem:[#allocation3 + $0x8] sm:$0xff]  ;;  %v3394_v54 = vpop.f32.mrb[0].mxu1 }
 0x17c   : > { %821 = vst.msk [vmem:[#allocation3 + $0x18] sm:$0xff] %vm817_vm3, %v3367_v43  ;;  %v1048_v55 = vadd.f32 %v3394_v54, %v835_v33  ;;  %v748_v2 = vpop.f32.mrb[3].mxu0  ;;  %v834_v3 = vld [vmem:[#allocation3] sm:$0xff]  ;;  %v968_v9 = vpop.f32.mrb[1].mxu1 }
 0x17d   : > { %820 = vst.msk [vmem:[#allocation3 + $0x10] sm:$0xff] %vm817_vm3, %v748_v2  ;;  %v1047_v10 = vadd.f32 %v968_v9, %v834_v3 }
 0x17e   : > { %1064 = vst.msk [vmem:[#allocation3 + $0x8] sm:$0xff] %vm817_vm3, %v1048_v55 }
 0x17f   : > { %1063 = vst.msk [vmem:[#allocation3] sm:$0xff] %vm817_vm3, %v1047_v10 }
 0x183   : > { %v3370_v11 = vpop.f32.mrb[4].mxu0  ;;  %v837_v13 = vld [vmem:[#allocation3 + $0x18] sm:$0xff]  ;;  %v3397_v14 = vpop.f32.mrb[2].mxu1 }
 0x184   : > { %823 = vst.msk [vmem:[#allocation3 + $0x28] sm:$0xff] %vm817_vm3, %v3370_v11  ;;  %v1050_v16 = vadd.f32 %v3397_v14, %v837_v13  ;;  %v758_v17 = vpop.f32.mrb[5].mxu0  ;;  %v836_v18 = vld [vmem:[#allocation3 + $0x10] sm:$0xff]  ;;  %v978_v20 = vpop.f32.mrb[3].mxu1 }
 0x185   : > { %822 = vst.msk [vmem:[#allocation3 + $0x20] sm:$0xff] %vm817_vm3, %v758_v17  ;;  %v1049_v21 = vadd.f32 %v978_v20, %v836_v18  ;;  %v1080_v22 = vld [vmem:[#allocation3 + $0x8] sm:$0xff] }
 0x186   : > { %1066 = vst.msk [vmem:[#allocation3 + $0x18] sm:$0xff] %vm817_vm3, %v1050_v16  ;;  %v1103_v23 = vadd.f32 %v4403_v15, %v1080_v22  ;;  %v1079_v24 = vld [vmem:[#allocation3] sm:$0xff] }
 0x187   : > { %1065 = vst.msk [vmem:[#allocation3 + $0x10] sm:$0xff] %vm817_vm3, %v1049_v21  ;;  %v1102_v25 = vadd.f32 %v4403_v15, %v1079_v24 }
 0x188   : > { %v1119_v28 = vmax.f32 %v1103_v23, 0.0 }
 0x189   : > { %v1118_v29 = vmax.f32 %v1102_v25, 0.0 }
 0x18a   : > { %1135 = vst.msk [vmem:[%s4411_s15 + $0x8] sm:$0xff] %vm817_vm3, %v1119_v28 }
 0x18b   : > { %v3373_v30 = vpop.f32.mrb[6].mxu0  ;;  %v839_v31 = vld [vmem:[#allocation3 + $0x28] sm:$0xff]  ;;  %v3400_v32 = vpop.f32.mrb[4].mxu1  ;;  %1134 = vst.msk [vmem:[%s4411_s15] sm:$0xff] %vm817_vm3, %v1118_v29 }
 0x18c   : > { %825 = vst.msk [vmem:[#allocation3 + $0x38] sm:$0xff] %vm817_vm3, %v3373_v30  ;;  %v1052_v34 = vadd.f32 %v3400_v32, %v839_v31  ;;  %v768_v35 = vpop.f32.mrb[7].mxu0  ;;  %v838_v37 = vld [vmem:[#allocation3 + $0x20] sm:$0xff]  ;;  %v988_v38 = vpop.f32.mrb[5].mxu1 }
 0x18d   : > { %824 = vst.msk [vmem:[#allocation3 + $0x30] sm:$0xff] %vm817_vm3, %v768_v35  ;;  %v1051_v39 = vadd.f32 %v988_v38, %v838_v37  ;;  %v1082_v40 = vld [vmem:[#allocation3 + $0x18] sm:$0xff] }
 0x18e   : > { %1068 = vst.msk [vmem:[#allocation3 + $0x28] sm:$0xff] %vm817_vm3, %v1052_v34  ;;  %v1105_v41 = vadd.f32 %v4403_v15, %v1082_v40  ;;  %v1081_v42 = vld [vmem:[#allocation3 + $0x10] sm:$0xff] }
 0x18f   : > { %1067 = vst.msk [vmem:[#allocation3 + $0x20] sm:$0xff] %vm817_vm3, %v1051_v39  ;;  %v1104_v44 = vadd.f32 %v4403_v15, %v1081_v42 }
 0x190   : > { %v1121_v45 = vmax.f32 %v1105_v41, 0.0 }
 0x191   : > { %v1120_v46 = vmax.f32 %v1104_v44, 0.0 }
 0x192   : > { %1137 = vst.msk [vmem:[%s4411_s15 + $0x18] sm:$0xff] %vm817_vm3, %v1121_v45 }
 0x193   : > { %v3376_v47 = vpop.f32.mrb[8].mxu0  ;;  %v841_v48 = vld [vmem:[#allocation3 + $0x38] sm:$0xff]  ;;  %v3403_v49 = vpop.f32.mrb[6].mxu1  ;;  %1136 = vst.msk [vmem:[%s4411_s15 + $0x10] sm:$0xff] %vm817_vm3, %v1120_v46 }
 0x194   : > { %827 = vst.msk [vmem:[#allocation3 + $0x48] sm:$0xff] %vm817_vm3, %v3376_v47  ;;  %v1054_v50 = vadd.f32 %v3403_v49, %v841_v48  ;;  %v778_v51 = vpop.f32.mrb[9].mxu0  ;;  %v840_v52 = vld [vmem:[#allocation3 + $0x30] sm:$0xff]  ;;  %v998_v53 = vpop.f32.mrb[7].mxu1 }
 0x195   : > { %826 = vst.msk [vmem:[#allocation3 + $0x40] sm:$0xff] %vm817_vm3, %v778_v51  ;;  %v1053_v56 = vadd.f32 %v998_v53, %v840_v52  ;;  %v1084_v57 = vld [vmem:[#allocation3 + $0x28] sm:$0xff] }
 0x196   : > { %1070 = vst.msk [vmem:[#allocation3 + $0x38] sm:$0xff] %vm817_vm3, %v1054_v50  ;;  %v1107_v4 = vadd.f32 %v4403_v15, %v1084_v57  ;;  %v1083_v58 = vld [vmem:[#allocation3 + $0x20] sm:$0xff] }
 0x197   : > { %1069 = vst.msk [vmem:[#allocation3 + $0x30] sm:$0xff] %vm817_vm3, %v1053_v56  ;;  %v1106_v59 = vadd.f32 %v4403_v15, %v1083_v58 }
 0x198   : > { %v1123_v60 = vmax.f32 %v1107_v4, 0.0 }
 0x199   : > { %v1122_v61 = vmax.f32 %v1106_v59, 0.0 }
 0x19a   : > { %1139 = vst.msk [vmem:[%s4411_s15 + $0x28] sm:$0xff] %vm817_vm3, %v1123_v60 }
 0x19b   : > { %v3379_v12 = vpop.f32.mrb[10].mxu0  ;;  %v843_v62 = vld [vmem:[#allocation3 + $0x48] sm:$0xff]  ;;  %v3406_v63 = vpop.f32.mrb[8].mxu1  ;;  %1138 = vst.msk [vmem:[%s4411_s15 + $0x20] sm:$0xff] %vm817_vm3, %v1122_v61 }
 0x19c   : > { %829 = vst.msk [vmem:[#allocation3 + $0x58] sm:$0xff] %vm817_vm3, %v3379_v12  ;;  %v1056_v19 = vadd.f32 %v3406_v63, %v843_v62  ;;  %v788_v0 = vpop.f32.mrb[11].mxu0  ;;  %v842_v1 = vld [vmem:[#allocation3 + $0x40] sm:$0xff]  ;;  %v1008_v5 = vpop.f32.mrb[9].mxu1 }
 0x19d   : > { %828 = vst.msk [vmem:[#allocation3 + $0x50] sm:$0xff] %vm817_vm3, %v788_v0  ;;  %v1055_v36 = vadd.f32 %v1008_v5, %v842_v1  ;;  %v1086_v6 = vld [vmem:[#allocation3 + $0x38] sm:$0xff] }
 0x19e   : > { %1072 = vst.msk [vmem:[#allocation3 + $0x48] sm:$0xff] %vm817_vm3, %v1056_v19  ;;  %v1109_v7 = vadd.f32 %v4403_v15, %v1086_v6  ;;  %v1085_v8 = vld [vmem:[#allocation3 + $0x30] sm:$0xff] }
 0x19f   : > { %1071 = vst.msk [vmem:[#allocation3 + $0x40] sm:$0xff] %vm817_vm3, %v1055_v36  ;;  %v1108_v27 = vadd.f32 %v4403_v15, %v1085_v8 }
 0x1a0   : > { %v1125_v26 = vmax.f32 %v1109_v7, 0.0 }
 0x1a1   : > { %v1124_v43 = vmax.f32 %v1108_v27, 0.0 }
 0x1a2   : > { %1141 = vst.msk [vmem:[%s4411_s15 + $0x38] sm:$0xff] %vm817_vm3, %v1125_v26 }
 0x1a3   : > { %v3382_v33 = vpop.f32.mrb[12].mxu0  ;;  %v845_v54 = vld [vmem:[#allocation3 + $0x58] sm:$0xff]  ;;  %v3409_v55 = vpop.f32.mrb[10].mxu1  ;;  %1140 = vst.msk [vmem:[%s4411_s15 + $0x30] sm:$0xff] %vm817_vm3, %v1124_v43 }
 0x1a4   : > { %831 = vst.msk [vmem:[#allocation3 + $0x68] sm:$0xff] %vm817_vm3, %v3382_v33  ;;  %v1058_v2 = vadd.f32 %v3409_v55, %v845_v54  ;;  %v798_v3 = vpop.f32.mrb[13].mxu0  ;;  %v844_v9 = vld [vmem:[#allocation3 + $0x50] sm:$0xff]  ;;  %v1018_v10 = vpop.f32.mrb[11].mxu1 }
 0x1a5   : > { %830 = vst.msk [vmem:[#allocation3 + $0x60] sm:$0xff] %vm817_vm3, %v798_v3  ;;  %v1057_v11 = vadd.f32 %v1018_v10, %v844_v9  ;;  %v1088_v13 = vld [vmem:[#allocation3 + $0x48] sm:$0xff] }
 0x1a6   : > { %1074 = vst.msk [vmem:[#allocation3 + $0x58] sm:$0xff] %vm817_vm3, %v1058_v2  ;;  %v1111_v14 = vadd.f32 %v4403_v15, %v1088_v13  ;;  %v1087_v16 = vld [vmem:[#allocation3 + $0x40] sm:$0xff] }
 0x1a7   : > { %1073 = vst.msk [vmem:[#allocation3 + $0x50] sm:$0xff] %vm817_vm3, %v1057_v11  ;;  %v1110_v17 = vadd.f32 %v4403_v15, %v1087_v16 }
 0x1a8   : > { %v1127_v18 = vmax.f32 %v1111_v14, 0.0 }
 0x1a9   : > { %v1126_v20 = vmax.f32 %v1110_v17, 0.0 }
 0x1aa   : > { %1143 = vst.msk [vmem:[%s4411_s15 + $0x48] sm:$0xff] %vm817_vm3, %v1127_v18 }
 0x1ab   : > { %v3385_v21 = vpop.f32.mrb[14].mxu0  ;;  %v847_v22 = vld [vmem:[#allocation3 + $0x68] sm:$0xff]  ;;  %v3412_v23 = vpop.f32.mrb[12].mxu1  ;;  %1142 = vst.msk [vmem:[%s4411_s15 + $0x40] sm:$0xff] %vm817_vm3, %v1126_v20 }
 0x1ac   : > { %833 = vst.msk [vmem:[#allocation3 + $0x78] sm:$0xff] %vm817_vm3, %v3385_v21  ;;  %v1060_v24 = vadd.f32 %v3412_v23, %v847_v22  ;;  %v808_v25 = vpop.f32.mrb[15].mxu0  ;;  %v846_v28 = vld [vmem:[#allocation3 + $0x60] sm:$0xff]  ;;  %v1028_v29 = vpop.f32.mrb[13].mxu1 }
 0x1ad   : > { %832 = vst.msk [vmem:[#allocation3 + $0x70] sm:$0xff] %vm817_vm3, %v808_v25  ;;  %v1059_v30 = vadd.f32 %v1028_v29, %v846_v28  ;;  %v1090_v31 = vld [vmem:[#allocation3 + $0x58] sm:$0xff] }
 0x1ae   : > { %1076 = vst.msk [vmem:[#allocation3 + $0x68] sm:$0xff] %vm817_vm3, %v1060_v24  ;;  %v1113_v32 = vadd.f32 %v4403_v15, %v1090_v31  ;;  %v1089_v34 = vld [vmem:[#allocation3 + $0x50] sm:$0xff] }
 0x1af   : > { %1075 = vst.msk [vmem:[#allocation3 + $0x60] sm:$0xff] %vm817_vm3, %v1059_v30  ;;  %v3424_v35 = vpop.f32.mrb[16].mxu0  ;;  %v1112_v37 = vadd.f32 %v4403_v15, %v1089_v34 }
 0x1b0   : > { %1300 = vst.msk [vmem:[#allocation3 + $0x8] sm:$0xff] %vm817_vm3, %v3424_v35  ;;  %v1220_v38 = vpop.f32.mrb[17].mxu0  ;;  %v1129_v39 = vmax.f32 %v1113_v32, 0.0 }
 0x1b1   : > { %1299 = vst.msk [vmem:[#allocation3] sm:$0xff] %vm817_vm3, %v1220_v38  ;;  %v1128_v40 = vmax.f32 %v1112_v37, 0.0 }
 0x1b2   : > { %1145 = vst.msk [vmem:[%s4411_s15 + $0x58] sm:$0xff] %vm817_vm3, %v1129_v39 }
 0x1b3   : > { %v849_v41 = vld [vmem:[#allocation3 + $0x78] sm:$0xff]  ;;  %v3415_v42 = vpop.f32.mrb[14].mxu1  ;;  %v3427_v44 = vpop.f32.mrb[18].mxu0  ;;  %1144 = vst.msk [vmem:[%s4411_s15 + $0x50] sm:$0xff] %vm817_vm3, %v1128_v40 }
 0x1b4   : > { %v1062_v45 = vadd.f32 %v3415_v42, %v849_v41  ;;  %1302 = vst.msk [vmem:[#allocation3 + $0x18] sm:$0xff] %vm817_vm3, %v3427_v44  ;;  %v848_v46 = vld [vmem:[#allocation3 + $0x70] sm:$0xff]  ;;  %v1038_v47 = vpop.f32.mrb[15].mxu1  ;;  %v1230_v48 = vpop.f32.mrb[19].mxu0 }
 0x1b5   : > { %v1061_v49 = vadd.f32 %v1038_v47, %v848_v46  ;;  %1301 = vst.msk [vmem:[#allocation3 + $0x10] sm:$0xff] %vm817_vm3, %v1230_v48  ;;  %v1092_v50 = vld [vmem:[#allocation3 + $0x68] sm:$0xff] }
 0x1b6   : > { %1078 = vst.msk [vmem:[#allocation3 + $0x78] sm:$0xff] %vm817_vm3, %v1062_v45  ;;  %v1115_v51 = vadd.f32 %v4403_v15, %v1092_v50  ;;  %v1091_v52 = vld [vmem:[#allocation3 + $0x60] sm:$0xff] }
 0x1b7   : > { %1077 = vst.msk [vmem:[#allocation3 + $0x70] sm:$0xff] %vm817_vm3, %v1061_v49  ;;  %v3430_v53 = vpop.f32.mrb[20].mxu0  ;;  %v1316_v56 = vld [vmem:[#allocation3 + $0x8] sm:$0xff]  ;;  %v3454_v57 = vpop.f32.mrb[16].mxu1  ;;  %v1114_v4 = vadd.f32 %v4403_v15, %v1091_v52 }
 0x1b8   : > { %1304 = vst.msk [vmem:[#allocation3 + $0x28] sm:$0xff] %vm817_vm3, %v3430_v53  ;;  %v1481_v58 = vadd.f32 %v3454_v57, %v1316_v56  ;;  %v1240_v59 = vpop.f32.mrb[21].mxu0  ;;  %v1315_v60 = vld [vmem:[#allocation3] sm:$0xff]  ;;  %v1401_v61 = vpop.f32.mrb[17].mxu1  ;;  %v1131_v12 = vmax.f32 %v1115_v51, 0.0 }
 0x1b9   : > { %1303 = vst.msk [vmem:[#allocation3 + $0x20] sm:$0xff] %vm817_vm3, %v1240_v59  ;;  %v1480_v62 = vadd.f32 %v1401_v61, %v1315_v60  ;;  %v1130_v63 = vmax.f32 %v1114_v4, 0.0 }
 0x1ba   : > { %1497 = vst.msk [vmem:[#allocation3 + $0x8] sm:$0xff] %vm817_vm3, %v1481_v58  ;;  %1147 = vst.msk [vmem:[%s4411_s15 + $0x68] sm:$0xff] %vm817_vm3, %v1131_v12 }
 0x1bb   : > { %1496 = vst.msk [vmem:[#allocation3] sm:$0xff] %vm817_vm3, %v1480_v62  ;;  %v3433_v19 = vpop.f32.mrb[22].mxu0  ;;  %v1318_v0 = vld [vmem:[#allocation3 + $0x18] sm:$0xff]  ;;  %v3457_v1 = vpop.f32.mrb[18].mxu1  ;;  %1146 = vst.msk [vmem:[%s4411_s15 + $0x60] sm:$0xff] %vm817_vm3, %v1130_v63 }
 0x1bc   : > { %1306 = vst.msk [vmem:[#allocation3 + $0x38] sm:$0xff] %vm817_vm3, %v3433_v19  ;;  %v1483_v5 = vadd.f32 %v3457_v1, %v1318_v0  ;;  %v1250_v36 = vpop.f32.mrb[23].mxu0  ;;  %v1317_v6 = vld [vmem:[#allocation3 + $0x10] sm:$0xff]  ;;  %v1411_v7 = vpop.f32.mrb[19].mxu1 }
 0x1bd   : > { %1305 = vst.msk [vmem:[#allocation3 + $0x30] sm:$0xff] %vm817_vm3, %v1250_v36  ;;  %v1482_v8 = vadd.f32 %v1411_v7, %v1317_v6  ;;  %v1094_v27 = vld [vmem:[#allocation3 + $0x78] sm:$0xff] }
 0x1be   : > { %1499 = vst.msk [vmem:[#allocation3 + $0x18] sm:$0xff] %vm817_vm3, %v1483_v5  ;;  %v1117_v26 = vadd.f32 %v4403_v15, %v1094_v27  ;;  %v1093_v43 = vld [vmem:[#allocation3 + $0x70] sm:$0xff] }
 0x1bf   : > { %1498 = vst.msk [vmem:[#allocation3 + $0x10] sm:$0xff] %vm817_vm3, %v1482_v8  ;;  %v3436_v33 = vpop.f32.mrb[24].mxu0  ;;  %v1320_v54 = vld [vmem:[#allocation3 + $0x28] sm:$0xff]  ;;  %v3460_v55 = vpop.f32.mrb[20].mxu1  ;;  %v1116_v2 = vadd.f32 %v4403_v15, %v1093_v43 }
 0x1c0   : > { %1308 = vst.msk [vmem:[#allocation3 + $0x48] sm:$0xff] %vm817_vm3, %v3436_v33  ;;  %v1485_v3 = vadd.f32 %v3460_v55, %v1320_v54  ;;  %v1260_v9 = vpop.f32.mrb[25].mxu0  ;;  %v1319_v10 = vld [vmem:[#allocation3 + $0x20] sm:$0xff]  ;;  %v1421_v11 = vpop.f32.mrb[21].mxu1  ;;  %v1133_v13 = vmax.f32 %v1117_v26, 0.0 }
 0x1c1   : > { %1307 = vst.msk [vmem:[#allocation3 + $0x40] sm:$0xff] %vm817_vm3, %v1260_v9  ;;  %v1484_v14 = vadd.f32 %v1421_v11, %v1319_v10  ;;  %v1132_v16 = vmax.f32 %v1116_v2, 0.0  ;;  %v1513_v17 = vld [vmem:[#allocation3 + $0x8] sm:$0xff] }
 0x1c2   : > { %1501 = vst.msk [vmem:[#allocation3 + $0x28] sm:$0xff] %vm817_vm3, %v1485_v3  ;;  %1149 = vst.msk [vmem:[%s4411_s15 + $0x78] sm:$0xff] %vm817_vm3, %v1133_v13  ;;  %v1536_v18 = vadd.f32 %v4403_v15, %v1513_v17  ;;  %v1512_v20 = vld [vmem:[#allocation3] sm:$0xff] }
 0x1c3   : > { %1500 = vst.msk [vmem:[#allocation3 + $0x20] sm:$0xff] %vm817_vm3, %v1484_v14  ;;  %v3439_v21 = vpop.f32.mrb[26].mxu0  ;;  %v1322_v22 = vld [vmem:[#allocation3 + $0x38] sm:$0xff]  ;;  %v3463_v23 = vpop.f32.mrb[22].mxu1  ;;  %1148 = vst.msk [vmem:[%s4411_s15 + $0x70] sm:$0xff] %vm817_vm3, %v1132_v16  ;;  %v1535_v24 = vadd.f32 %v4403_v15, %v1512_v20 }
 0x1c4   : > { %1310 = vst.msk [vmem:[#allocation3 + $0x58] sm:$0xff] %vm817_vm3, %v3439_v21  ;;  %v1487_v25 = vadd.f32 %v3463_v23, %v1322_v22  ;;  %v1270_v28 = vpop.f32.mrb[27].mxu0  ;;  %v1321_v29 = vld [vmem:[#allocation3 + $0x30] sm:$0xff]  ;;  %v1431_v30 = vpop.f32.mrb[23].mxu1  ;;  %v1552_v31 = vmax.f32 %v1536_v18, 0.0 }
 0x1c5   : > { %1309 = vst.msk [vmem:[#allocation3 + $0x50] sm:$0xff] %vm817_vm3, %v1270_v28  ;;  %v1486_v32 = vadd.f32 %v1431_v30, %v1321_v29  ;;  %v1551_v34 = vmax.f32 %v1535_v24, 0.0  ;;  %v1515_v35 = vld [vmem:[#allocation3 + $0x18] sm:$0xff] }
 0x1c6   : > { %1503 = vst.msk [vmem:[#allocation3 + $0x38] sm:$0xff] %vm817_vm3, %v1487_v25  ;;  %3062 = vst.msk [vmem:[%s4411_s15 + $0x88] sm:$0xff] %vm817_vm3, %v1552_v31  ;;  %v1538_v37 = vadd.f32 %v4403_v15, %v1515_v35  ;;  %v1514_v38 = vld [vmem:[#allocation3 + $0x10] sm:$0xff] }
 0x1c7   : > { %1502 = vst.msk [vmem:[#allocation3 + $0x30] sm:$0xff] %vm817_vm3, %v1486_v32  ;;  %v3442_v39 = vpop.f32.mrb[28].mxu0  ;;  %v1324_v40 = vld [vmem:[#allocation3 + $0x48] sm:$0xff]  ;;  %v3466_v41 = vpop.f32.mrb[24].mxu1  ;;  %3061 = vst.msk [vmem:[%s4411_s15 + $0x80] sm:$0xff] %vm817_vm3, %v1551_v34  ;;  %v1537_v42 = vadd.f32 %v4403_v15, %v1514_v38 }
 0x1c8   : > { %1312 = vst.msk [vmem:[#allocation3 + $0x68] sm:$0xff] %vm817_vm3, %v3442_v39  ;;  %v1489_v44 = vadd.f32 %v3466_v41, %v1324_v40  ;;  %v1280_v45 = vpop.f32.mrb[29].mxu0  ;;  %v1323_v46 = vld [vmem:[#allocation3 + $0x40] sm:$0xff]  ;;  %v1441_v47 = vpop.f32.mrb[25].mxu1  ;;  %v1554_v48 = vmax.f32 %v1538_v37, 0.0 }
 0x1c9   : > { %1311 = vst.msk [vmem:[#allocation3 + $0x60] sm:$0xff] %vm817_vm3, %v1280_v45  ;;  %v1488_v49 = vadd.f32 %v1441_v47, %v1323_v46  ;;  %v1553_v50 = vmax.f32 %v1537_v42, 0.0  ;;  %v1517_v51 = vld [vmem:[#allocation3 + $0x28] sm:$0xff] }
 0x1ca   : > { %1505 = vst.msk [vmem:[#allocation3 + $0x48] sm:$0xff] %vm817_vm3, %v1489_v44  ;;  %3064 = vst.msk [vmem:[%s4411_s15 + $0x98] sm:$0xff] %vm817_vm3, %v1554_v48  ;;  %v1540_v52 = vadd.f32 %v4403_v15, %v1517_v51  ;;  %v1516_v53 = vld [vmem:[#allocation3 + $0x20] sm:$0xff] }
 0x1cb   : > { %1504 = vst.msk [vmem:[#allocation3 + $0x40] sm:$0xff] %vm817_vm3, %v1488_v49  ;;  %v3445_v56 = vpop.f32.mrb[30].mxu0  ;;  %v1326_v57 = vld [vmem:[#allocation3 + $0x58] sm:$0xff]  ;;  %v3469_v4 = vpop.f32.mrb[26].mxu1  ;;  %3063 = vst.msk [vmem:[%s4411_s15 + $0x90] sm:$0xff] %vm817_vm3, %v1553_v50  ;;  %v1539_v58 = vadd.f32 %v4403_v15, %v1516_v53 }
 0x1cc   : > { %1314 = vst.msk [vmem:[#allocation3 + $0x78] sm:$0xff] %vm817_vm3, %v3445_v56  ;;  %v1491_v59 = vadd.f32 %v3469_v4, %v1326_v57  ;;  %v1290_v60 = vpop.f32.mrb[31].mxu0  ;;  %v1325_v61 = vld [vmem:[#allocation3 + $0x50] sm:$0xff]  ;;  %v1451_v12 = vpop.f32.mrb[27].mxu1  ;;  %v1556_v62 = vmax.f32 %v1540_v52, 0.0 }
 0x1cd   : > { %1313 = vst.msk [vmem:[#allocation3 + $0x70] sm:$0xff] %vm817_vm3, %v1290_v60  ;;  %v1490_v63 = vadd.f32 %v1451_v12, %v1325_v61  ;;  %v1555_v19 = vmax.f32 %v1539_v58, 0.0  ;;  %v1519_v0 = vld [vmem:[#allocation3 + $0x38] sm:$0xff] }
 0x1ce   : > { %1507 = vst.msk [vmem:[#allocation3 + $0x58] sm:$0xff] %vm817_vm3, %v1491_v59  ;;  %3066 = vst.msk [vmem:[%s4411_s15 + $0xa8] sm:$0xff] %vm817_vm3, %v1556_v62  ;;  %v1542_v1 = vadd.f32 %v4403_v15, %v1519_v0  ;;  %v1518_v5 = vld [vmem:[#allocation3 + $0x30] sm:$0xff] }
 0x1cf   : > { %1506 = vst.msk [vmem:[#allocation3 + $0x50] sm:$0xff] %vm817_vm3, %v1490_v63  ;;  %v1328_v36 = vld [vmem:[#allocation3 + $0x68] sm:$0xff]  ;;  %v3472_v6 = vpop.f32.mrb[28].mxu1  ;;  %v3484_v7 = vpop.f32.mrb[32].mxu0  ;;  %3065 = vst.msk [vmem:[%s4411_s15 + $0xa0] sm:$0xff] %vm817_vm3, %v1555_v19  ;;  %v1541_v8 = vadd.f32 %v4403_v15, %v1518_v5 }
 0x1d0   : > { %v1493_v27 = vadd.f32 %v3472_v6, %v1328_v36  ;;  %1815 = vst.msk [vmem:[#allocation3 + $0x8] sm:$0xff] %vm817_vm3, %v3484_v7  ;;  %v1327_v26 = vld [vmem:[#allocation3 + $0x60] sm:$0xff]  ;;  %v1461_v43 = vpop.f32.mrb[29].mxu1  ;;  %v1735_v33 = vpop.f32.mrb[33].mxu0  ;;  %v1558_v54 = vmax.f32 %v1542_v1, 0.0 }
 0x1d1   : > { %v1492_v55 = vadd.f32 %v1461_v43, %v1327_v26  ;;  %1814 = vst.msk [vmem:[#allocation3] sm:$0xff] %vm817_vm3, %v1735_v33  ;;  %v1557_v2 = vmax.f32 %v1541_v8, 0.0  ;;  %v1521_v3 = vld [vmem:[#allocation3 + $0x48] sm:$0xff] }
 0x1d2   : > { %1509 = vst.msk [vmem:[#allocation3 + $0x68] sm:$0xff] %vm817_vm3, %v1493_v27  ;;  %3068 = vst.msk [vmem:[%s4411_s15 + $0xb8] sm:$0xff] %vm817_vm3, %v1558_v54  ;;  %v1544_v9 = vadd.f32 %v4403_v15, %v1521_v3  ;;  %v1520_v10 = vld [vmem:[#allocation3 + $0x40] sm:$0xff] }
 0x1d3   : > { %1508 = vst.msk [vmem:[#allocation3 + $0x60] sm:$0xff] %vm817_vm3, %v1492_v55  ;;  %v1330_v11 = vld [vmem:[#allocation3 + $0x78] sm:$0xff]  ;;  %v3475_v13 = vpop.f32.mrb[30].mxu1  ;;  %v3487_v14 = vpop.f32.mrb[34].mxu0  ;;  %3067 = vst.msk [vmem:[%s4411_s15 + $0xb0] sm:$0xff] %vm817_vm3, %v1557_v2  ;;  %v1543_v16 = vadd.f32 %v4403_v15, %v1520_v10 }
 0x1d4   : > { %v1495_v17 = vadd.f32 %v3475_v13, %v1330_v11  ;;  %1817 = vst.msk [vmem:[#allocation3 + $0x18] sm:$0xff] %vm817_vm3, %v3487_v14  ;;  %v1329_v18 = vld [vmem:[#allocation3 + $0x70] sm:$0xff]  ;;  %v1471_v20 = vpop.f32.mrb[31].mxu1  ;;  %v1745_v21 = vpop.f32.mrb[35].mxu0  ;;  %v1560_v22 = vmax.f32 %v1544_v9, 0.0 }
 0x1d5   : > { %v1494_v23 = vadd.f32 %v1471_v20, %v1329_v18  ;;  %1816 = vst.msk [vmem:[#allocation3 + $0x10] sm:$0xff] %vm817_vm3, %v1745_v21  ;;  %v1559_v24 = vmax.f32 %v1543_v16, 0.0  ;;  %v1523_v25 = vld [vmem:[#allocation3 + $0x58] sm:$0xff] }
 0x1d6   : > { %1511 = vst.msk [vmem:[#allocation3 + $0x78] sm:$0xff] %vm817_vm3, %v1495_v17  ;;  %3070 = vst.msk [vmem:[%s4411_s15 + $0xc8] sm:$0xff] %vm817_vm3, %v1560_v22  ;;  %v1546_v28 = vadd.f32 %v4403_v15, %v1523_v25  ;;  %v1522_v29 = vld [vmem:[#allocation3 + $0x50] sm:$0xff] }
 0x1d7   : > { %1510 = vst.msk [vmem:[#allocation3 + $0x70] sm:$0xff] %vm817_vm3, %v1494_v23  ;;  %v3490_v30 = vpop.f32.mrb[36].mxu0  ;;  %v1831_v31 = vld [vmem:[#allocation3 + $0x8] sm:$0xff]  ;;  %v3514_v32 = vpop.f32.mrb[32].mxu1  ;;  %3069 = vst.msk [vmem:[%s4411_s15 + $0xc0] sm:$0xff] %vm817_vm3, %v1559_v24  ;;  %v1545_v34 = vadd.f32 %v4403_v15, %v1522_v29 }
 0x1d8   : > { %1819 = vst.msk [vmem:[#allocation3 + $0x28] sm:$0xff] %vm817_vm3, %v3490_v30  ;;  %v2044_v35 = vadd.f32 %v3514_v32, %v1831_v31  ;;  %v1755_v37 = vpop.f32.mrb[37].mxu0  ;;  %v1830_v38 = vld [vmem:[#allocation3] sm:$0xff]  ;;  %v1964_v39 = vpop.f32.mrb[33].mxu1  ;;  %v1562_v40 = vmax.f32 %v1546_v28, 0.0 }
 0x1d9   : > { %1818 = vst.msk [vmem:[#allocation3 + $0x20] sm:$0xff] %vm817_vm3, %v1755_v37  ;;  %v2043_v41 = vadd.f32 %v1964_v39, %v1830_v38  ;;  %v1561_v42 = vmax.f32 %v1545_v34, 0.0  ;;  %v1525_v44 = vld [vmem:[#allocation3 + $0x68] sm:$0xff] }
 0x1da   : > { %2060 = vst.msk [vmem:[#allocation3 + $0x8] sm:$0xff] %vm817_vm3, %v2044_v35  ;;  %3072 = vst.msk [vmem:[%s4411_s15 + $0xd8] sm:$0xff] %vm817_vm3, %v1562_v40  ;;  %v1548_v45 = vadd.f32 %v4403_v15, %v1525_v44  ;;  %v1524_v46 = vld [vmem:[#allocation3 + $0x60] sm:$0xff] }
 0x1db   : > { %2059 = vst.msk [vmem:[#allocation3] sm:$0xff] %vm817_vm3, %v2043_v41  ;;  %v3493_v47 = vpop.f32.mrb[38].mxu0  ;;  %v1833_v48 = vld [vmem:[#allocation3 + $0x18] sm:$0xff]  ;;  %v3517_v49 = vpop.f32.mrb[34].mxu1  ;;  %3071 = vst.msk [vmem:[%s4411_s15 + $0xd0] sm:$0xff] %vm817_vm3, %v1561_v42  ;;  %v1547_v50 = vadd.f32 %v4403_v15, %v1524_v46 }
 0x1dc   : > { %1821 = vst.msk [vmem:[#allocation3 + $0x38] sm:$0xff] %vm817_vm3, %v3493_v47  ;;  %v2046_v51 = vadd.f32 %v3517_v49, %v1833_v48  ;;  %v1765_v52 = vpop.f32.mrb[39].mxu0  ;;  %v1832_v53 = vld [vmem:[#allocation3 + $0x10] sm:$0xff]  ;;  %v1974_v56 = vpop.f32.mrb[35].mxu1  ;;  %v1564_v57 = vmax.f32 %v1548_v45, 0.0 }
 0x1dd   : > { %1820 = vst.msk [vmem:[#allocation3 + $0x30] sm:$0xff] %vm817_vm3, %v1765_v52  ;;  %v2045_v4 = vadd.f32 %v1974_v56, %v1832_v53  ;;  %v1563_v58 = vmax.f32 %v1547_v50, 0.0  ;;  %v1527_v59 = vld [vmem:[#allocation3 + $0x78] sm:$0xff] }
 0x1de   : > { %2062 = vst.msk [vmem:[#allocation3 + $0x18] sm:$0xff] %vm817_vm3, %v2046_v51  ;;  %3074 = vst.msk [vmem:[%s4411_s15 + $0xe8] sm:$0xff] %vm817_vm3, %v1564_v57  ;;  %v1550_v60 = vadd.f32 %v4403_v15, %v1527_v59  ;;  %v1526_v61 = vld [vmem:[#allocation3 + $0x70] sm:$0xff] }
 0x1df   : > { %2061 = vst.msk [vmem:[#allocation3 + $0x10] sm:$0xff] %vm817_vm3, %v2045_v4  ;;  %v3496_v12 = vpop.f32.mrb[40].mxu0  ;;  %v1835_v62 = vld [vmem:[#allocation3 + $0x28] sm:$0xff]  ;;  %v3520_v63 = vpop.f32.mrb[36].mxu1  ;;  %3073 = vst.msk [vmem:[%s4411_s15 + $0xe0] sm:$0xff] %vm817_vm3, %v1563_v58  ;;  %v1549_v19 = vadd.f32 %v4403_v15, %v1526_v61 }
 0x1e0   : > { %1823 = vst.msk [vmem:[#allocation3 + $0x48] sm:$0xff] %vm817_vm3, %v3496_v12  ;;  %v2048_v0 = vadd.f32 %v3520_v63, %v1835_v62  ;;  %v1775_v1 = vpop.f32.mrb[41].mxu0  ;;  %v1834_v5 = vld [vmem:[#allocation3 + $0x20] sm:$0xff]  ;;  %v1984_v36 = vpop.f32.mrb[37].mxu1  ;;  %v1566_v6 = vmax.f32 %v1550_v60, 0.0 }
 0x1e1   : > { %1822 = vst.msk [vmem:[#allocation3 + $0x40] sm:$0xff] %vm817_vm3, %v1775_v1  ;;  %v2047_v7 = vadd.f32 %v1984_v36, %v1834_v5  ;;  %v1565_v8 = vmax.f32 %v1549_v19, 0.0  ;;  %v2076_v27 = vld [vmem:[#allocation3 + $0x8] sm:$0xff] }
 0x1e2   : > { %2064 = vst.msk [vmem:[#allocation3 + $0x28] sm:$0xff] %vm817_vm3, %v2048_v0  ;;  %3076 = vst.msk [vmem:[%s4411_s15 + $0xf8] sm:$0xff] %vm817_vm3, %v1566_v6  ;;  %v2099_v26 = vadd.f32 %v4403_v15, %v2076_v27  ;;  %v2075_v43 = vld [vmem:[#allocation3] sm:$0xff] }
 0x1e3   : > { %2063 = vst.msk [vmem:[#allocation3 + $0x20] sm:$0xff] %vm817_vm3, %v2047_v7  ;;  %v3499_v33 = vpop.f32.mrb[42].mxu0  ;;  %v1837_v54 = vld [vmem:[#allocation3 + $0x38] sm:$0xff]  ;;  %v3523_v55 = vpop.f32.mrb[38].mxu1  ;;  %3075 = vst.msk [vmem:[%s4411_s15 + $0xf0] sm:$0xff] %vm817_vm3, %v1565_v8  ;;  %v2098_v2 = vadd.f32 %v4403_v15, %v2075_v43 }
 0x1e4   : > { %1825 = vst.msk [vmem:[#allocation3 + $0x58] sm:$0xff] %vm817_vm3, %v3499_v33  ;;  %v2050_v3 = vadd.f32 %v3523_v55, %v1837_v54  ;;  %v1785_v9 = vpop.f32.mrb[43].mxu0  ;;  %v1836_v10 = vld [vmem:[#allocation3 + $0x30] sm:$0xff]  ;;  %v1994_v11 = vpop.f32.mrb[39].mxu1  ;;  %v2115_v13 = vmax.f32 %v2099_v26, 0.0 }
 0x1e5   : > { %1824 = vst.msk [vmem:[#allocation3 + $0x50] sm:$0xff] %vm817_vm3, %v1785_v9  ;;  %v2049_v14 = vadd.f32 %v1994_v11, %v1836_v10  ;;  %v2114_v16 = vmax.f32 %v2098_v2, 0.0  ;;  %v2078_v17 = vld [vmem:[#allocation3 + $0x18] sm:$0xff] }
 0x1e6   : > { %2066 = vst.msk [vmem:[#allocation3 + $0x38] sm:$0xff] %vm817_vm3, %v2050_v3  ;;  %3117 = vst.msk [vmem:[%s4411_s15 + $0x108] sm:$0xff] %vm817_vm3, %v2115_v13  ;;  %v2101_v18 = vadd.f32 %v4403_v15, %v2078_v17  ;;  %v2077_v20 = vld [vmem:[#allocation3 + $0x10] sm:$0xff] }
 0x1e7   : > { %2065 = vst.msk [vmem:[#allocation3 + $0x30] sm:$0xff] %vm817_vm3, %v2049_v14  ;;  %v3502_v21 = vpop.f32.mrb[44].mxu0  ;;  %v1839_v22 = vld [vmem:[#allocation3 + $0x48] sm:$0xff]  ;;  %v3526_v23 = vpop.f32.mrb[40].mxu1  ;;  %3116 = vst.msk [vmem:[%s4411_s15 + $0x100] sm:$0xff] %vm817_vm3, %v2114_v16  ;;  %v2100_v24 = vadd.f32 %v4403_v15, %v2077_v20 }
 0x1e8   : > { %1827 = vst.msk [vmem:[#allocation3 + $0x68] sm:$0xff] %vm817_vm3, %v3502_v21  ;;  %v2052_v25 = vadd.f32 %v3526_v23, %v1839_v22  ;;  %v1795_v28 = vpop.f32.mrb[45].mxu0  ;;  %v1838_v29 = vld [vmem:[#allocation3 + $0x40] sm:$0xff]  ;;  %v2004_v30 = vpop.f32.mrb[41].mxu1  ;;  %v2117_v31 = vmax.f32 %v2101_v18, 0.0 }
 0x1e9   : > { %1826 = vst.msk [vmem:[#allocation3 + $0x60] sm:$0xff] %vm817_vm3, %v1795_v28  ;;  %v2051_v32 = vadd.f32 %v2004_v30, %v1838_v29  ;;  %v2116_v34 = vmax.f32 %v2100_v24, 0.0  ;;  %v2080_v35 = vld [vmem:[#allocation3 + $0x28] sm:$0xff] }
 0x1ea   : > { %2068 = vst.msk [vmem:[#allocation3 + $0x48] sm:$0xff] %vm817_vm3, %v2052_v25  ;;  %3119 = vst.msk [vmem:[%s4411_s15 + $0x118] sm:$0xff] %vm817_vm3, %v2117_v31  ;;  %v2103_v37 = vadd.f32 %v4403_v15, %v2080_v35  ;;  %v2079_v38 = vld [vmem:[#allocation3 + $0x20] sm:$0xff] }
 0x1eb   : > { %2067 = vst.msk [vmem:[#allocation3 + $0x40] sm:$0xff] %vm817_vm3, %v2051_v32  ;;  %v3505_v39 = vpop.f32.mrb[46].mxu0  ;;  %v1841_v40 = vld [vmem:[#allocation3 + $0x58] sm:$0xff]  ;;  %v3529_v41 = vpop.f32.mrb[42].mxu1  ;;  %3118 = vst.msk [vmem:[%s4411_s15 + $0x110] sm:$0xff] %vm817_vm3, %v2116_v34  ;;  %v2102_v42 = vadd.f32 %v4403_v15, %v2079_v38 }
 0x1ec   : > { %1829 = vst.msk [vmem:[#allocation3 + $0x78] sm:$0xff] %vm817_vm3, %v3505_v39  ;;  %v2054_v44 = vadd.f32 %v3529_v41, %v1841_v40  ;;  %v1805_v45 = vpop.f32.mrb[47].mxu0  ;;  %v1840_v46 = vld [vmem:[#allocation3 + $0x50] sm:$0xff]  ;;  %v2014_v47 = vpop.f32.mrb[43].mxu1  ;;  %v2119_v48 = vmax.f32 %v2103_v37, 0.0 }
 0x1ed   : > { %1828 = vst.msk [vmem:[#allocation3 + $0x70] sm:$0xff] %vm817_vm3, %v1805_v45  ;;  %v2053_v49 = vadd.f32 %v2014_v47, %v1840_v46  ;;  %v2118_v50 = vmax.f32 %v2102_v42, 0.0  ;;  %v2082_v51 = vld [vmem:[#allocation3 + $0x38] sm:$0xff] }
 0x1ee   : > { %2070 = vst.msk [vmem:[#allocation3 + $0x58] sm:$0xff] %vm817_vm3, %v2054_v44  ;;  %3121 = vst.msk [vmem:[%s4411_s15 + $0x128] sm:$0xff] %vm817_vm3, %v2119_v48  ;;  %v2105_v52 = vadd.f32 %v4403_v15, %v2082_v51  ;;  %v2081_v53 = vld [vmem:[#allocation3 + $0x30] sm:$0xff] }
 0x1ef   : > { %2069 = vst.msk [vmem:[#allocation3 + $0x50] sm:$0xff] %vm817_vm3, %v2053_v49  ;;  %v1843_v56 = vld [vmem:[#allocation3 + $0x68] sm:$0xff]  ;;  %v3532_v57 = vpop.f32.mrb[44].mxu1  ;;  %v3544_v4 = vpop.f32.mrb[48].mxu0  ;;  %3120 = vst.msk [vmem:[%s4411_s15 + $0x120] sm:$0xff] %vm817_vm3, %v2118_v50  ;;  %v2104_v58 = vadd.f32 %v4403_v15, %v2081_v53 }
 0x1f0   : > { %v2056_v59 = vadd.f32 %v3532_v57, %v1843_v56  ;;  %2297 = vst.msk [vmem:[#allocation3 + $0x8] sm:$0xff] %vm817_vm3, %v3544_v4  ;;  %v1842_v60 = vld [vmem:[#allocation3 + $0x60] sm:$0xff]  ;;  %v2024_v61 = vpop.f32.mrb[45].mxu1  ;;  %v2217_v12 = vpop.f32.mrb[49].mxu0  ;;  %v2121_v62 = vmax.f32 %v2105_v52, 0.0 }
 0x1f1   : > { %v2055_v63 = vadd.f32 %v2024_v61, %v1842_v60  ;;  %2296 = vst.msk [vmem:[#allocation3] sm:$0xff] %vm817_vm3, %v2217_v12  ;;  %v2120_v19 = vmax.f32 %v2104_v58, 0.0  ;;  %v2084_v0 = vld [vmem:[#allocation3 + $0x48] sm:$0xff] }
 0x1f2   : > { %2072 = vst.msk [vmem:[#allocation3 + $0x68] sm:$0xff] %vm817_vm3, %v2056_v59  ;;  %3123 = vst.msk [vmem:[%s4411_s15 + $0x138] sm:$0xff] %vm817_vm3, %v2121_v62  ;;  %v2107_v1 = vadd.f32 %v4403_v15, %v2084_v0  ;;  %v2083_v5 = vld [vmem:[#allocation3 + $0x40] sm:$0xff] }
 0x1f3   : > { %2071 = vst.msk [vmem:[#allocation3 + $0x60] sm:$0xff] %vm817_vm3, %v2055_v63  ;;  %v1845_v36 = vld [vmem:[#allocation3 + $0x78] sm:$0xff]  ;;  %v3535_v6 = vpop.f32.mrb[46].mxu1  ;;  %v3547_v7 = vpop.f32.mrb[50].mxu0  ;;  %3122 = vst.msk [vmem:[%s4411_s15 + $0x130] sm:$0xff] %vm817_vm3, %v2120_v19  ;;  %v2106_v8 = vadd.f32 %v4403_v15, %v2083_v5 }
 0x1f4   : > { %v2058_v27 = vadd.f32 %v3535_v6, %v1845_v36  ;;  %2299 = vst.msk [vmem:[#allocation3 + $0x18] sm:$0xff] %vm817_vm3, %v3547_v7  ;;  %v1844_v26 = vld [vmem:[#allocation3 + $0x70] sm:$0xff]  ;;  %v2034_v43 = vpop.f32.mrb[47].mxu1  ;;  %v2227_v33 = vpop.f32.mrb[51].mxu0  ;;  %v2123_v54 = vmax.f32 %v2107_v1, 0.0 }
 0x1f5   : > { %v2057_v55 = vadd.f32 %v2034_v43, %v1844_v26  ;;  %2298 = vst.msk [vmem:[#allocation3 + $0x10] sm:$0xff] %vm817_vm3, %v2227_v33  ;;  %v2122_v2 = vmax.f32 %v2106_v8, 0.0  ;;  %v2086_v3 = vld [vmem:[#allocation3 + $0x58] sm:$0xff] }
 0x1f6   : > { %2074 = vst.msk [vmem:[#allocation3 + $0x78] sm:$0xff] %vm817_vm3, %v2058_v27  ;;  %3125 = vst.msk [vmem:[%s4411_s15 + $0x148] sm:$0xff] %vm817_vm3, %v2123_v54  ;;  %v2109_v9 = vadd.f32 %v4403_v15, %v2086_v3  ;;  %v2085_v10 = vld [vmem:[#allocation3 + $0x50] sm:$0xff]  ;;  %v4666_v27 = vld [vmem:[%s4887_s3] ss:$0 sm:$0xff] }
 0x1f7   : > { %2073 = vst.msk [vmem:[#allocation3 + $0x70] sm:$0xff] %vm817_vm3, %v2057_v55  ;;  %v3550_v11 = vpop.f32.mrb[52].mxu0  ;;  %v2313_v13 = vld [vmem:[#allocation3 + $0x8] sm:$0xff]  ;;  %v3574_v14 = vpop.f32.mrb[48].mxu1  ;;  %3124 = vst.msk [vmem:[%s4411_s15 + $0x140] sm:$0xff] %vm817_vm3, %v2122_v2  ;;  %v2108_v16 = vadd.f32 %v4403_v15, %v2085_v10 }
 0x1f8   : > { %2301 = vst.msk [vmem:[#allocation3 + $0x28] sm:$0xff] %vm817_vm3, %v3550_v11  ;;  %v2478_v17 = vadd.f32 %v3574_v14, %v2313_v13  ;;  %v2237_v18 = vpop.f32.mrb[53].mxu0  ;;  %v2312_v20 = vld [vmem:[#allocation3] sm:$0xff]  ;;  %v2398_v21 = vpop.f32.mrb[49].mxu1  ;;  %v2125_v22 = vmax.f32 %v2109_v9, 0.0 }
 0x1f9   : > { %2300 = vst.msk [vmem:[#allocation3 + $0x20] sm:$0xff] %vm817_vm3, %v2237_v18  ;;  %v2477_v23 = vadd.f32 %v2398_v21, %v2312_v20  ;;  %v2124_v24 = vmax.f32 %v2108_v16, 0.0  ;;  %v2088_v25 = vld [vmem:[#allocation3 + $0x68] sm:$0xff] }
 0x1fa   : > { %2494 = vst.msk [vmem:[#allocation3 + $0x8] sm:$0xff] %vm817_vm3, %v2478_v17  ;;  %3127 = vst.msk [vmem:[%s4411_s15 + $0x158] sm:$0xff] %vm817_vm3, %v2125_v22  ;;  %v2111_v28 = vadd.f32 %v4403_v15, %v2088_v25  ;;  %v2087_v29 = vld [vmem:[#allocation3 + $0x60] sm:$0xff] }
 0x1fb   : > { %2493 = vst.msk [vmem:[#allocation3] sm:$0xff] %vm817_vm3, %v2477_v23  ;;  %v3553_v30 = vpop.f32.mrb[54].mxu0  ;;  %v2315_v31 = vld [vmem:[#allocation3 + $0x18] sm:$0xff]  ;;  %v3577_v32 = vpop.f32.mrb[50].mxu1  ;;  %3126 = vst.msk [vmem:[%s4411_s15 + $0x150] sm:$0xff] %vm817_vm3, %v2124_v24  ;;  %v2110_v34 = vadd.f32 %v4403_v15, %v2087_v29 }
 0x1fc   : > { %2303 = vst.msk [vmem:[#allocation3 + $0x38] sm:$0xff] %vm817_vm3, %v3553_v30  ;;  %v2480_v35 = vadd.f32 %v3577_v32, %v2315_v31  ;;  %v2247_v37 = vpop.f32.mrb[55].mxu0  ;;  %v2314_v38 = vld [vmem:[#allocation3 + $0x10] sm:$0xff]  ;;  %v2408_v39 = vpop.f32.mrb[51].mxu1  ;;  %v2127_v40 = vmax.f32 %v2111_v28, 0.0 }
 0x1fd   : > { %2302 = vst.msk [vmem:[#allocation3 + $0x30] sm:$0xff] %vm817_vm3, %v2247_v37  ;;  %v2479_v41 = vadd.f32 %v2408_v39, %v2314_v38  ;;  %v2126_v42 = vmax.f32 %v2110_v34, 0.0  ;;  %v2090_v44 = vld [vmem:[#allocation3 + $0x78] sm:$0xff] }
 0x1fe   : > { %2496 = vst.msk [vmem:[#allocation3 + $0x18] sm:$0xff] %vm817_vm3, %v2480_v35  ;;  %3129 = vst.msk [vmem:[%s4411_s15 + $0x168] sm:$0xff] %vm817_vm3, %v2127_v40  ;;  %v2113_v45 = vadd.f32 %v4403_v15, %v2090_v44  ;;  %v2089_v46 = vld [vmem:[#allocation3 + $0x70] sm:$0xff] }
 0x1ff   : > { %2495 = vst.msk [vmem:[#allocation3 + $0x10] sm:$0xff] %vm817_vm3, %v2479_v41  ;;  %v3556_v47 = vpop.f32.mrb[56].mxu0  ;;  %v2317_v48 = vld [vmem:[#allocation3 + $0x28] sm:$0xff]  ;;  %v3580_v49 = vpop.f32.mrb[52].mxu1  ;;  %3128 = vst.msk [vmem:[%s4411_s15 + $0x160] sm:$0xff] %vm817_vm3, %v2126_v42  ;;  %v2112_v50 = vadd.f32 %v4403_v15, %v2089_v46 }
 0x200   : > { %2305 = vst.msk [vmem:[#allocation3 + $0x48] sm:$0xff] %vm817_vm3, %v3556_v47  ;;  %v2482_v51 = vadd.f32 %v3580_v49, %v2317_v48  ;;  %v2257_v52 = vpop.f32.mrb[57].mxu0  ;;  %v2316_v53 = vld [vmem:[#allocation3 + $0x20] sm:$0xff]  ;;  %v2418_v56 = vpop.f32.mrb[53].mxu1  ;;  %v2129_v57 = vmax.f32 %v2113_v45, 0.0 }
 0x201   : > { %v2510_v4 = vld [vmem:[#allocation3 + $0x8] sm:$0xff]  ;;  %2304 = vst.msk [vmem:[#allocation3 + $0x40] sm:$0xff] %vm817_vm3, %v2257_v52  ;;  %v2481_v58 = vadd.f32 %v2418_v56, %v2316_v53  ;;  %v2128_v59 = vmax.f32 %v2112_v50, 0.0 }
 0x202   : > { %v2533_v60 = vadd.f32 %v4403_v15, %v2510_v4  ;;  %v2509_v61 = vld [vmem:[#allocation3] sm:$0xff]  ;;  %2498 = vst.msk [vmem:[#allocation3 + $0x28] sm:$0xff] %vm817_vm3, %v2482_v51  ;;  %3131 = vst.msk [vmem:[%s4411_s15 + $0x178] sm:$0xff] %vm817_vm3, %v2129_v57 }
 0x203   : > { %v2532_v12 = vadd.f32 %v4403_v15, %v2509_v61  ;;  %2497 = vst.msk [vmem:[#allocation3 + $0x20] sm:$0xff] %vm817_vm3, %v2481_v58  ;;  %v3559_v62 = vpop.f32.mrb[58].mxu0  ;;  %v2319_v63 = vld [vmem:[#allocation3 + $0x38] sm:$0xff]  ;;  %v3583_v19 = vpop.f32.mrb[54].mxu1  ;;  %3130 = vst.msk [vmem:[%s4411_s15 + $0x170] sm:$0xff] %vm817_vm3, %v2128_v59 }
 0x204   : > { %v2549_v0 = vmax.f32 %v2533_v60, 0.0  ;;  %2307 = vst.msk [vmem:[#allocation3 + $0x58] sm:$0xff] %vm817_vm3, %v3559_v62  ;;  %v2484_v1 = vadd.f32 %v3583_v19, %v2319_v63  ;;  %v2267_v5 = vpop.f32.mrb[59].mxu0  ;;  %v2318_v36 = vld [vmem:[#allocation3 + $0x30] sm:$0xff]  ;;  %v2428_v6 = vpop.f32.mrb[55].mxu1 }
 0x205   : > { %v2548_v7 = vmax.f32 %v2532_v12, 0.0  ;;  %v2512_v8 = vld [vmem:[#allocation3 + $0x18] sm:$0xff]  ;;  %2306 = vst.msk [vmem:[#allocation3 + $0x50] sm:$0xff] %vm817_vm3, %v2267_v5  ;;  %v2483_v15 = vadd.f32 %v2428_v6, %v2318_v36 }
 0x206   : > { %3172 = vst.msk [vmem:[%s4411_s15 + $0x188] sm:$0xff] %vm817_vm3, %v2549_v0  ;;  %v2535_v26 = vadd.f32 %v4666_v27, %v2512_v8  ;;  %v2511_v43 = vld [vmem:[#allocation3 + $0x10] sm:$0xff]  ;;  %2500 = vst.msk [vmem:[#allocation3 + $0x38] sm:$0xff] %vm817_vm3, %v2484_v1 }
 0x207   : > { %3171 = vst.msk [vmem:[%s4411_s15 + $0x180] sm:$0xff] %vm817_vm3, %v2548_v7  ;;  %v2534_v33 = vadd.f32 %v4666_v27, %v2511_v43  ;;  %2499 = vst.msk [vmem:[#allocation3 + $0x30] sm:$0xff] %vm817_vm3, %v2483_v15  ;;  %v3562_v54 = vpop.f32.mrb[60].mxu0  ;;  %v2321_v55 = vld [vmem:[#allocation3 + $0x48] sm:$0xff]  ;;  %v3586_v2 = vpop.f32.mrb[56].mxu1 }
 0x208   : > { %v2551_v3 = vmax.f32 %v2535_v26, 0.0  ;;  %2309 = vst.msk [vmem:[#allocation3 + $0x68] sm:$0xff] %vm817_vm3, %v3562_v54  ;;  %v2486_v9 = vadd.f32 %v3586_v2, %v2321_v55  ;;  %v2277_v10 = vpop.f32.mrb[61].mxu0  ;;  %v2320_v11 = vld [vmem:[#allocation3 + $0x40] sm:$0xff]  ;;  %v2438_v13 = vpop.f32.mrb[57].mxu1 }
 0x209   : > { %v2550_v14 = vmax.f32 %v2534_v33, 0.0  ;;  %v2514_v16 = vld [vmem:[#allocation3 + $0x28] sm:$0xff]  ;;  %2308 = vst.msk [vmem:[#allocation3 + $0x60] sm:$0xff] %vm817_vm3, %v2277_v10  ;;  %v2485_v17 = vadd.f32 %v2438_v13, %v2320_v11  ;;  %v2753_v10 = vld [vmem:[%s4411_s15 + $0x18] sm:$0xff] (%p3819_p5)  ;;  %v2755_v11 = vld [vmem:[%s4411_s15 + $0x20] sm:$0xff] (%p3819_p5) }
 0x20a   : > { %3174 = vst.msk [vmem:[%s4411_s15 + $0x198] sm:$0xff] %vm817_vm3, %v2551_v3  ;;  %v2537_v18 = vadd.f32 %v4666_v27, %v2514_v16  ;;  %v2513_v20 = vld [vmem:[#allocation3 + $0x20] sm:$0xff]  ;;  %2502 = vst.msk [vmem:[#allocation3 + $0x48] sm:$0xff] %vm817_vm3, %v2486_v9  ;;  %v2749_v3 = vld [vmem:[%s4411_s15 + $0x8] sm:$0xff] (%p3819_p5) }
 0x20b   : > { %3173 = vst.msk [vmem:[%s4411_s15 + $0x190] sm:$0xff] %vm817_vm3, %v2550_v14  ;;  %v2536_v21 = vadd.f32 %v4666_v27, %v2513_v20  ;;  %2501 = vst.msk [vmem:[#allocation3 + $0x40] sm:$0xff] %vm817_vm3, %v2485_v17  ;;  %v3565_v22 = vpop.f32.mrb[62].mxu0  ;;  %v2323_v23 = vld [vmem:[#allocation3 + $0x58] sm:$0xff]  ;;  %v3589_v24 = vpop.f32.mrb[58].mxu1  ;;  %v2751_v9 = vld [vmem:[%s4411_s15 + $0x10] sm:$0xff] (%p3819_p5) }
 0x20c   : > { %v2553_v25 = vmax.f32 %v2537_v18, 0.0  ;;  %2311 = vst.msk [vmem:[#allocation3 + $0x78] sm:$0xff] %vm817_vm3, %v3565_v22  ;;  %v2488_v28 = vadd.f32 %v3589_v24, %v2323_v23  ;;  %v2287_v29 = vpop.f32.mrb[63].mxu0  ;;  %v2322_v30 = vld [vmem:[#allocation3 + $0x50] sm:$0xff]  ;;  %v2448_v31 = vpop.f32.mrb[59].mxu1  ;;  %v2757_v13 = vld [vmem:[%s4411_s15 + $0x28] sm:$0xff] (%p3819_p5) }
 0x20d   : > { %v2552_v32 = vmax.f32 %v2536_v21, 0.0  ;;  %v2516_v34 = vld [vmem:[#allocation3 + $0x38] sm:$0xff]  ;;  %2310 = vst.msk [vmem:[#allocation3 + $0x70] sm:$0xff] %vm817_vm3, %v2287_v29  ;;  %v2487_v35 = vadd.f32 %v2448_v31, %v2322_v30  ;;  %v2759_v14 = vld [vmem:[%s4411_s15 + $0x30] sm:$0xff] (%p3819_p5)  ;;  %v2763_v17 = vld [vmem:[%s4411_s15 + $0x40] sm:$0xff] (%p3819_p5) }
 0x20e   : > { %3176 = vst.msk [vmem:[%s4411_s15 + $0x1a8] sm:$0xff] %vm817_vm3, %v2553_v25  ;;  %v2539_v37 = vadd.f32 %v4666_v27, %v2516_v34  ;;  %v2515_v38 = vld [vmem:[#allocation3 + $0x30] sm:$0xff]  ;;  %2504 = vst.msk [vmem:[#allocation3 + $0x58] sm:$0xff] %vm817_vm3, %v2488_v28  ;;  %v2761_v16 = vld [vmem:[%s4411_s15 + $0x38] sm:$0xff] (%p3819_p5) }
 0x20f   : > { %3175 = vst.msk [vmem:[%s4411_s15 + $0x1a0] sm:$0xff] %vm817_vm3, %v2552_v32  ;;  %v2538_v39 = vadd.f32 %v4666_v27, %v2515_v38  ;;  %2503 = vst.msk [vmem:[#allocation3 + $0x50] sm:$0xff] %vm817_vm3, %v2487_v35  ;;  %v2325_v40 = vld [vmem:[#allocation3 + $0x68] sm:$0xff]  ;;  %v3592_v41 = vpop.f32.mrb[60].mxu1  ;;  %v2767_v20 = vld [vmem:[%s4411_s15 + $0x50] sm:$0xff] (%p3819_p5) }
 0x210   : > { %v2555_v42 = vmax.f32 %v2539_v37, 0.0  ;;  %v2490_v44 = vadd.f32 %v3592_v41, %v2325_v40  ;;  %v2324_v45 = vld [vmem:[#allocation3 + $0x60] sm:$0xff]  ;;  %v2458_v46 = vpop.f32.mrb[61].mxu1  ;;  %v2765_v18 = vld [vmem:[%s4411_s15 + $0x48] sm:$0xff] (%p3819_p5)  ;;  %v2769_v21 = vld [vmem:[%s4411_s15 + $0x58] sm:$0xff] (%p3819_p5)  ;;  %2750 = vst [vmem:[%s4742_s27 + $0x8] sm:$0xff] (%p3819_p5), %v2749_v3 }
 0x211   : > { %v2554_v47 = vmax.f32 %v2538_v39, 0.0  ;;  %v2518_v48 = vld [vmem:[#allocation3 + $0x48] sm:$0xff]  ;;  %v2489_v49 = vadd.f32 %v2458_v46, %v2324_v45  ;;  %2752 = vst [vmem:[%s4742_s27 + $0x10] sm:$0xff] (%p3819_p5), %v2751_v9  ;;  %2754 = vst [vmem:[%s4742_s27 + $0x18] sm:$0xff] (%p3819_p5), %v2753_v10  ;;  %v2771_v22 = vld [vmem:[%s4411_s15 + $0x60] sm:$0xff] (%p3819_p5) }
 0x212   : > { %3178 = vst.msk [vmem:[%s4411_s15 + $0x1b8] sm:$0xff] %vm817_vm3, %v2555_v42  ;;  %v2541_v50 = vadd.f32 %v4666_v27, %v2518_v48  ;;  %v2517_v51 = vld [vmem:[#allocation3 + $0x40] sm:$0xff]  ;;  %2506 = vst.msk [vmem:[#allocation3 + $0x68] sm:$0xff] %vm817_vm3, %v2490_v44  ;;  %v2773_v23 = vld [vmem:[%s4411_s15 + $0x68] sm:$0xff] (%p3819_p5) }
 0x213   : > { %3177 = vst.msk [vmem:[%s4411_s15 + $0x1b0] sm:$0xff] %vm817_vm3, %v2554_v47  ;;  %v2540_v52 = vadd.f32 %v4666_v27, %v2517_v51  ;;  %2505 = vst.msk [vmem:[#allocation3 + $0x60] sm:$0xff] %vm817_vm3, %v2489_v49  ;;  %v2327_v53 = vld [vmem:[#allocation3 + $0x78] sm:$0xff]  ;;  %v3595_v56 = vpop.f32.mrb[62].mxu1  ;;  %v2775_v24 = vld [vmem:[%s4411_s15 + $0x70] sm:$0xff] (%p3819_p5) }
 0x214   : > { %v2557_v57 = vmax.f32 %v2541_v50, 0.0  ;;  %v2492_v4 = vadd.f32 %v3595_v56, %v2327_v53  ;;  %v2326_v58 = vld [vmem:[#allocation3 + $0x70] sm:$0xff]  ;;  %v2468_v59 = vpop.f32.mrb[63].mxu1  ;;  %2756 = vst [vmem:[%s4742_s27 + $0x20] sm:$0xff] (%p3819_p5), %v2755_v11  ;;  %2758 = vst [vmem:[%s4742_s27 + $0x28] sm:$0xff] (%p3819_p5), %v2757_v13  ;;  %v2777_v25 = vld [vmem:[%s4411_s15 + $0x78] sm:$0xff] (%p3819_p5) }
 0x215   : > { %v2556_v60 = vmax.f32 %v2540_v52, 0.0  ;;  %v2520_v61 = vld [vmem:[#allocation3 + $0x58] sm:$0xff]  ;;  %v2491_v12 = vadd.f32 %v2468_v59, %v2326_v58  ;;  %2760 = vst [vmem:[%s4742_s27 + $0x30] sm:$0xff] (%p3819_p5), %v2759_v14  ;;  %2762 = vst [vmem:[%s4742_s27 + $0x38] sm:$0xff] (%p3819_p5), %v2761_v16  ;;  %v2779_v28 = vld [vmem:[%s4411_s15 + $0x80] sm:$0xff] (%p3819_p5) }
 0x216   : > { %3180 = vst.msk [vmem:[%s4411_s15 + $0x1c8] sm:$0xff] %vm817_vm3, %v2557_v57  ;;  %v2543_v62 = vadd.f32 %v4666_v27, %v2520_v61  ;;  %v2519_v63 = vld [vmem:[#allocation3 + $0x50] sm:$0xff]  ;;  %2508 = vst.msk [vmem:[#allocation3 + $0x78] sm:$0xff] %vm817_vm3, %v2492_v4  ;;  %v2781_v29 = vld [vmem:[%s4411_s15 + $0x88] sm:$0xff] (%p3819_p5) }
 0x217   : > { %3179 = vst.msk [vmem:[%s4411_s15 + $0x1c0] sm:$0xff] %vm817_vm3, %v2556_v60  ;;  %v2542_v19 = vadd.f32 %v4666_v27, %v2519_v63  ;;  %2507 = vst.msk [vmem:[#allocation3 + $0x70] sm:$0xff] %vm817_vm3, %v2491_v12  ;;  %v2783_v30 = vld [vmem:[%s4411_s15 + $0x90] sm:$0xff] (%p3819_p5)  ;;  %v2785_v31 = vld [vmem:[%s4411_s15 + $0x98] sm:$0xff] (%p3819_p5) }
 0x218   : > { %v2559_v0 = vmax.f32 %v2543_v62, 0.0  ;;  %2764 = vst [vmem:[%s4742_s27 + $0x40] sm:$0xff] (%p3819_p5), %v2763_v17  ;;  %2766 = vst [vmem:[%s4742_s27 + $0x48] sm:$0xff] (%p3819_p5), %v2765_v18  ;;  %v2787_v32 = vld [vmem:[%s4411_s15 + $0xa0] sm:$0xff] (%p3819_p5)  ;;  %v2789_v34 = vld [vmem:[%s4411_s15 + $0xa8] sm:$0xff] (%p3819_p5) }
 0x219   : > { %v2558_v1 = vmax.f32 %v2542_v19, 0.0  ;;  %v2522_v5 = vld [vmem:[#allocation3 + $0x68] sm:$0xff]  ;;  %2768 = vst [vmem:[%s4742_s27 + $0x50] sm:$0xff] (%p3819_p5), %v2767_v20  ;;  %2770 = vst [vmem:[%s4742_s27 + $0x58] sm:$0xff] (%p3819_p5), %v2769_v21  ;;  %v2791_v35 = vld [vmem:[%s4411_s15 + $0xb0] sm:$0xff] (%p3819_p5) }
 0x21a   : > { %3182 = vst.msk [vmem:[%s4411_s15 + $0x1d8] sm:$0xff] %vm817_vm3, %v2559_v0  ;;  %v2545_v36 = vadd.f32 %v4666_v27, %v2522_v5  ;;  %v2521_v6 = vld [vmem:[#allocation3 + $0x60] sm:$0xff]  ;;  %2772 = vst [vmem:[%s4742_s27 + $0x60] sm:$0xff] (%p3819_p5), %v2771_v22  ;;  %v2793_v37 = vld [vmem:[%s4411_s15 + $0xb8] sm:$0xff] (%p3819_p5) }
 0x21b   : > { %3181 = vst.msk [vmem:[%s4411_s15 + $0x1d0] sm:$0xff] %vm817_vm3, %v2558_v1  ;;  %v2544_v7 = vadd.f32 %v4666_v27, %v2521_v6  ;;  %2774 = vst [vmem:[%s4742_s27 + $0x68] sm:$0xff] (%p3819_p5), %v2773_v23  ;;  %v2795_v38 = vld [vmem:[%s4411_s15 + $0xc0] sm:$0xff] (%p3819_p5)  ;;  %v2797_v39 = vld [vmem:[%s4411_s15 + $0xc8] sm:$0xff] (%p3819_p5) }
 0x21c   : > { %v2561_v8 = vmax.f32 %v2545_v36, 0.0  ;;  %2776 = vst [vmem:[%s4742_s27 + $0x70] sm:$0xff] (%p3819_p5), %v2775_v24  ;;  %2778 = vst [vmem:[%s4742_s27 + $0x78] sm:$0xff] (%p3819_p5), %v2777_v25  ;;  %v2799_v40 = vld [vmem:[%s4411_s15 + $0xd0] sm:$0xff] (%p3819_p5)  ;;  %v2801_v41 = vld [vmem:[%s4411_s15 + $0xd8] sm:$0xff] (%p3819_p5) }
 0x21d   : > { %v2560_v15 = vmax.f32 %v2544_v7, 0.0  ;;  %v2524_v26 = vld [vmem:[#allocation3 + $0x78] sm:$0xff]  ;;  %2587 = sbr.rel (!%p3819_p5) target bundleno = 568 (0x238), region = 40  ;;  %2780 = vst [vmem:[%s4742_s27 + $0x100] sm:$0xff] (%p3819_p5), %v2779_v28  ;;  %2782 = vst [vmem:[%s4742_s27 + $0x108] sm:$0xff] (%p3819_p5), %v2781_v29  ;;  %v2803_v42 = vld [vmem:[%s4411_s15 + $0xe0] sm:$0xff] (%p3819_p5) }
 0x21e   : > { %3184 = vst.msk [vmem:[%s4411_s15 + $0x1e8] sm:$0xff] %vm817_vm3, %v2561_v8  ;;  %v2547_v43 = vadd.f32 %v4666_v27, %v2524_v26  ;;  %v2523_v33 = vld [vmem:[#allocation3 + $0x70] sm:$0xff]  ;;  %2784 = vst [vmem:[%s4742_s27 + $0x110] sm:$0xff] (%p3819_p5), %v2783_v30  ;;  %v2805_v44 = vld [vmem:[%s4411_s15 + $0xe8] sm:$0xff] (%p3819_p5) }
 0x21f   : > { %3183 = vst.msk [vmem:[%s4411_s15 + $0x1e0] sm:$0xff] %vm817_vm3, %v2560_v15  ;;  %v2546_v54 = vadd.f32 %v4666_v27, %v2523_v33  ;;  %v2747_v27 = vld [vmem:[%s4411_s15] sm:$0xff] (%p3819_p5)  ;;  %2786 = vst [vmem:[%s4742_s27 + $0x118] sm:$0xff] (%p3819_p5), %v2785_v31  ;;  %v2807_v45 = vld [vmem:[%s4411_s15 + $0xf0] sm:$0xff] (%p3819_p5) }
 0x220   : > { %v2563_v55 = vmax.f32 %v2547_v43, 0.0  ;;  %2748 = vst [vmem:[%s4742_s27] sm:$0xff] (%p3819_p5), %v2747_v27  ;;  %2788 = vst [vmem:[%s4742_s27 + $0x120] sm:$0xff] (%p3819_p5), %v2787_v32  ;;  %v2809_v46 = vld [vmem:[%s4411_s15 + $0xf8] sm:$0xff] (%p3819_p5)  ;;  %v2811_v47 = vld [vmem:[%s4411_s15 + $0x100] sm:$0xff] (%p3819_p5) }
 0x221   : > { %v2562_v2 = vmax.f32 %v2546_v54, 0.0  ;;  %2790 = vst [vmem:[%s4742_s27 + $0x128] sm:$0xff] (%p3819_p5), %v2789_v34  ;;  %2792 = vst [vmem:[%s4742_s27 + $0x130] sm:$0xff] (%p3819_p5), %v2791_v35  ;;  %v2813_v48 = vld [vmem:[%s4411_s15 + $0x108] sm:$0xff] (%p3819_p5)  ;;  %v2815_v49 = vld [vmem:[%s4411_s15 + $0x110] sm:$0xff] (%p3819_p5) }
 0x222   : > { %3186 = vst.msk [vmem:[%s4411_s15 + $0x1f8] sm:$0xff] %vm817_vm3, %v2563_v55  ;;  %2794 = vst [vmem:[%s4742_s27 + $0x138] sm:$0xff] (%p3819_p5), %v2793_v37  ;;  %v2817_v50 = vld [vmem:[%s4411_s15 + $0x118] sm:$0xff] (%p3819_p5)  ;;  %v2819_v51 = vld [vmem:[%s4411_s15 + $0x120] sm:$0xff] (%p3819_p5) }
 0x223   : > { %3185 = vst.msk [vmem:[%s4411_s15 + $0x1f0] sm:$0xff] %vm817_vm3, %v2562_v2  ;;  %2796 = vst [vmem:[%s4742_s27 + $0x140] sm:$0xff] (%p3819_p5), %v2795_v38  ;;  %v2821_v52 = vld [vmem:[%s4411_s15 + $0x128] sm:$0xff] (%p3819_p5)  ;;  %v2823_v53 = vld [vmem:[%s4411_s15 + $0x130] sm:$0xff] (%p3819_p5) }
 0x224   : > { %2798 = vst [vmem:[%s4742_s27 + $0x148] sm:$0xff] %v2797_v39  ;;  %2800 = vst [vmem:[%s4742_s27 + $0x150] sm:$0xff] %v2799_v40  ;;  %v2825_v56 = vld [vmem:[%s4411_s15 + $0x138] sm:$0xff]  ;;  %v2827_v57 = vld [vmem:[%s4411_s15 + $0x140] sm:$0xff] }
 0x225   : > { %2802 = vst [vmem:[%s4742_s27 + $0x158] sm:$0xff] %v2801_v41  ;;  %2804 = vst [vmem:[%s4742_s27 + $0x160] sm:$0xff] %v2803_v42  ;;  %v2829_v4 = vld [vmem:[%s4411_s15 + $0x148] sm:$0xff]  ;;  %v2831_v58 = vld [vmem:[%s4411_s15 + $0x150] sm:$0xff] }
 0x226   : > { %2806 = vst [vmem:[%s4742_s27 + $0x168] sm:$0xff] %v2805_v44  ;;  %2808 = vst [vmem:[%s4742_s27 + $0x170] sm:$0xff] %v2807_v45  ;;  %v2833_v59 = vld [vmem:[%s4411_s15 + $0x158] sm:$0xff]  ;;  %v2835_v60 = vld [vmem:[%s4411_s15 + $0x160] sm:$0xff] }
 0x227   : > { %2810 = vst [vmem:[%s4742_s27 + $0x178] sm:$0xff] %v2809_v46  ;;  %2812 = vst [vmem:[%s4742_s27 + $0x200] sm:$0xff] %v2811_v47  ;;  %v2837_v61 = vld [vmem:[%s4411_s15 + $0x168] sm:$0xff]  ;;  %v2839_v12 = vld [vmem:[%s4411_s15 + $0x170] sm:$0xff] }
 0x228   : > { %2814 = vst [vmem:[%s4742_s27 + $0x208] sm:$0xff] %v2813_v48  ;;  %2816 = vst [vmem:[%s4742_s27 + $0x210] sm:$0xff] %v2815_v49  ;;  %v2841_v62 = vld [vmem:[%s4411_s15 + $0x178] sm:$0xff]  ;;  %v2843_v63 = vld [vmem:[%s4411_s15 + $0x180] sm:$0xff] }
 0x229   : > { %2818 = vst [vmem:[%s4742_s27 + $0x218] sm:$0xff] %v2817_v50  ;;  %2820 = vst [vmem:[%s4742_s27 + $0x220] sm:$0xff] %v2819_v51  ;;  %v2845_v19 = vld [vmem:[%s4411_s15 + $0x188] sm:$0xff]  ;;  %v2847_v0 = vld [vmem:[%s4411_s15 + $0x190] sm:$0xff] }
 0x22a   : > { %2822 = vst [vmem:[%s4742_s27 + $0x228] sm:$0xff] %v2821_v52  ;;  %2824 = vst [vmem:[%s4742_s27 + $0x230] sm:$0xff] %v2823_v53  ;;  %v2849_v1 = vld [vmem:[%s4411_s15 + $0x198] sm:$0xff]  ;;  %v2851_v5 = vld [vmem:[%s4411_s15 + $0x1a0] sm:$0xff] }
 0x22b   : > { %2826 = vst [vmem:[%s4742_s27 + $0x238] sm:$0xff] %v2825_v56  ;;  %2828 = vst [vmem:[%s4742_s27 + $0x240] sm:$0xff] %v2827_v57  ;;  %v2853_v36 = vld [vmem:[%s4411_s15 + $0x1a8] sm:$0xff]  ;;  %v2855_v6 = vld [vmem:[%s4411_s15 + $0x1b0] sm:$0xff] }
 0x22c   : > { %2830 = vst [vmem:[%s4742_s27 + $0x248] sm:$0xff] %v2829_v4  ;;  %2832 = vst [vmem:[%s4742_s27 + $0x250] sm:$0xff] %v2831_v58  ;;  %v2857_v7 = vld [vmem:[%s4411_s15 + $0x1b8] sm:$0xff]  ;;  %v2859_v8 = vld [vmem:[%s4411_s15 + $0x1c0] sm:$0xff] }
 0x22d   : > { %2834 = vst [vmem:[%s4742_s27 + $0x258] sm:$0xff] %v2833_v59  ;;  %2836 = vst [vmem:[%s4742_s27 + $0x260] sm:$0xff] %v2835_v60  ;;  %v2861_v15 = vld [vmem:[%s4411_s15 + $0x1c8] sm:$0xff]  ;;  %v2863_v26 = vld [vmem:[%s4411_s15 + $0x1d0] sm:$0xff] }
 0x22e   : > { %2838 = vst [vmem:[%s4742_s27 + $0x268] sm:$0xff] %v2837_v61  ;;  %2840 = vst [vmem:[%s4742_s27 + $0x270] sm:$0xff] %v2839_v12  ;;  %v2865_v43 = vld [vmem:[%s4411_s15 + $0x1d8] sm:$0xff]  ;;  %v2867_v33 = vld [vmem:[%s4411_s15 + $0x1e0] sm:$0xff] }
 0x22f   : > { %2842 = vst [vmem:[%s4742_s27 + $0x278] sm:$0xff] %v2841_v62  ;;  %2844 = vst [vmem:[%s4742_s27 + $0x300] sm:$0xff] %v2843_v63  ;;  %v2869_v54 = vld [vmem:[%s4411_s15 + $0x1e8] sm:$0xff]  ;;  %v2871_v55 = vld [vmem:[%s4411_s15 + $0x1f0] sm:$0xff] }
 0x230   : > { %2846 = vst [vmem:[%s4742_s27 + $0x308] sm:$0xff] %v2845_v19  ;;  %2848 = vst [vmem:[%s4742_s27 + $0x310] sm:$0xff] %v2847_v0  ;;  %v2873_v2 = vld [vmem:[%s4411_s15 + $0x1f8] sm:$0xff] }
 0x231   : > { %2850 = vst [vmem:[%s4742_s27 + $0x318] sm:$0xff] %v2849_v1  ;;  %2852 = vst [vmem:[%s4742_s27 + $0x320] sm:$0xff] %v2851_v5 }
 0x232   : > { %2854 = vst [vmem:[%s4742_s27 + $0x328] sm:$0xff] %v2853_v36  ;;  %2856 = vst [vmem:[%s4742_s27 + $0x330] sm:$0xff] %v2855_v6 }
 0x233   : > { %2858 = vst [vmem:[%s4742_s27 + $0x338] sm:$0xff] %v2857_v7  ;;  %2860 = vst [vmem:[%s4742_s27 + $0x340] sm:$0xff] %v2859_v8 }
 0x234   : > { %2862 = vst [vmem:[%s4742_s27 + $0x348] sm:$0xff] %v2861_v15  ;;  %2864 = vst [vmem:[%s4742_s27 + $0x350] sm:$0xff] %v2863_v26 }
 0x235   : > { %2866 = vst [vmem:[%s4742_s27 + $0x358] sm:$0xff] %v2865_v43  ;;  %2868 = vst [vmem:[%s4742_s27 + $0x360] sm:$0xff] %v2867_v33 }
 0x236   : > { %2870 = vst [vmem:[%s4742_s27 + $0x368] sm:$0xff] %v2869_v54  ;;  %2872 = vst [vmem:[%s4742_s27 + $0x370] sm:$0xff] %v2871_v55 }
 0x237   : > { %2874 = vst [vmem:[%s4742_s27 + $0x378] sm:$0xff] %v2873_v2 }
 0x238 PF: > { %s14_s21 = sadd.s32 1, %s3744_s21   ;;  %s4890_s15 = smov %s3724_s16 }
 0x239   : > { %p11_p12 = scmp.ge.s32.totalorder %s14_s21, 6   ;;  %s4891_s16 = smov %s3830_s30 }
 0x23a   : > { %s4892_s17 = smov %s3736_s19  ;;  %s4893_s18 = smov %s3740_s20 }
 0x23b   : > { %s4894_s19 = smov %s4897_s22  ;;  %s4895_s20 = smov %s4901_s23 }
 0x23c   :  { %13 = sbr.rel (!%p11_p12) target bundleno = 4 (0x4), region = 120 }

</bundles_post_ra>
